<compile_context>
chip_gen: v7x
topology: tpu7x:2x2x1
jax: 0.10.0
libtpu: 0.0.40
codegen_flags: <defaults>
</compile_context>

<pallas_src>
import numpy as np
import jax
import jax.numpy as jnp
from jax import lax
from jax.experimental import pallas as pl
from jax.experimental.pallas import tpu as pltpu


def _round_up(x, m):
    return ((x + m - 1) // m) * m


# ----------------------------- Pallas kernels -----------------------------

def _conv_mm_kernel(p_ref, w_ref, b_ref, o_ref):
    # One (TM, Kd) tile of im2col patches @ (Kd, Cout) folded conv1+bn1 weights
    # on the MXU: bf16 operands, f32 accumulation, +bias, ReLU, bf16 store.
    acc = jnp.dot(p_ref[...], w_ref[...], preferred_element_type=jnp.float32)
    acc = acc + b_ref[...]
    o_ref[...] = jnp.maximum(acc, 0.0).astype(o_ref.dtype)


def _make_feature_loss_kernel(inv_norm):
    """Loss kernel tiled over the pooled-spatial axis N (grid axis 0, reduction).

    f_ref: (B, TN, C) bf16 pooled features, w_ref: (B, K, TN) f32 pooled weights.
    Accumulates sufficient statistics in VMEM scratch; finalizes a scalar loss.
    """
    def kernel(f_ref, w_ref, o_ref, s0_ref, s1_ref, s2_ref):
        pid = pl.program_id(0)

        @pl.when(pid == 0)
        def _():
            s0_ref[...] = jnp.zeros_like(s0_ref)
            s1_ref[...] = jnp.zeros_like(s1_ref)
            s2_ref[...] = jnp.zeros_like(s2_ref)

        f16 = f_ref[...]                                  # (B, TN, C) bf16
        f32 = f16.astype(jnp.float32)
        w32 = w_ref[...]                                  # (B, K, TN) f32
        w16 = w32.astype(jnp.bfloat16)

        g = jnp.sum(f32 * f32, axis=2)                    # (B, TN)   Σ_c f²
        s0_ref[...] += jnp.sum(w32, axis=2)               # (B, K)    Σ_n w
        s1_ref[...] += jnp.einsum('bkn,bnc->bkc', w16, f16,
                                  preferred_element_type=jnp.float32)  # Σ_n w·f
        s2_ref[...] += jnp.sum(w32 * g[:, None, :], axis=2)            # Σ_n w·Σ_c f²

        @pl.when(pid == pl.num_programs(0) - 1)
        def _():
            s0 = s0_ref[...]
            s1 = s1_ref[...]
            s2 = s2_ref[...]
            # Σ_n w Σ_c (f - mean)²  ==  S2 − Σ_c S1²/S0  (per (b, k)).
            # Guard empty classes (S0==0 ⇒ S1==S2==0 ⇒ contribution 0).
            denom = jnp.where(s0 > 0.0, s0, 1.0)
            per_class = s2 - jnp.sum(s1 * s1, axis=2) / denom          # (B, K)
            o_ref[0, 0] = jnp.sum(per_class) * inv_norm
    return kernel


# ------------------------------ wrappers ----------------------------------

def _conv_bn_relu_pallas(x_nhwc, wmat, bias, *, tm=512):
    """7x7 stride-2 pad-3 conv (BN folded) + ReLU via im2col + tiled Pallas matmul."""
    B, H, W, C = x_nhwc.shape
    ksize, stride, pad = 7, 2, 3
    xp = jnp.pad(x_nhwc.astype(jnp.bfloat16),
                 ((0, 0), (pad, pad), (pad, pad), (0, 0)))
    OH = (H + 2 * pad - ksize) // stride + 1
    OW = (W + 2 * pad - ksize) // stride + 1
    cols = []
    for ki in range(ksize):
        for kj in range(ksize):
            cols.append(xp[:, ki:ki + stride * OH:stride,
                           kj:kj + stride * OW:stride, :])
    patches = jnp.stack(cols, axis=3).reshape(B * OH * OW, ksize * ksize * C)
    # TODO(synk): on v5e, build patches in-kernel from spatial tiles
    # (memory_space=pl.ANY + manual DMA) to avoid the 49x im2col HBM round trip;
    # bf16 patches halve that traffic in the meantime.
    M, Kd = patches.shape
    Cout = wmat.shape[1]

    TM = min(tm, max(8, _round_up(M, 8)))
    M_pad = _round_up(M, TM)
    if M_pad != M:
        patches = jnp.pad(patches, ((0, M_pad - M), (0, 0)))

    out = pl.pallas_call(
        _conv_mm_kernel,
        out_shape=jax.ShapeDtypeStruct((M_pad, Cout), jnp.bfloat16),
        grid=(M_pad // TM,),
        in_specs=[pl.BlockSpec((TM, Kd), lambda i: (i, 0)),
                  pl.BlockSpec((Kd, Cout), lambda i: (0, 0)),
                  pl.BlockSpec((1, Cout), lambda i: (0, 0))],
        out_specs=pl.BlockSpec((TM, Cout), lambda i: (i, 0)),
        compiler_params=pltpu.CompilerParams(
            dimension_semantics=("parallel",),
            vmem_limit_bytes=32 * 1024 * 1024),
    )(patches, wmat.astype(jnp.bfloat16), bias.reshape(1, Cout).astype(jnp.float32))
    return out[:M].reshape(B, OH, OW, Cout)


def feature_loss(img1_nchw, class_im1_nchw, wmat, bias):
    B, _, H, W = img1_nchw.shape
    x = jnp.transpose(img1_nchw, (0, 2, 3, 1))                   # NCHW -> NHWC

    feat = _conv_bn_relu_pallas(x, wmat, bias)                   # (B, H/2, W/2, 64) bf16

    # maxpool 3x3 / stride 2 / pad 1 (glue)
    feat = lax.reduce_window(feat, jnp.array(-jnp.inf, feat.dtype), lax.max,
                             (1, 3, 3, 1), (1, 2, 2, 1),
                             [(0, 0), (1, 1), (1, 1), (0, 0)])
    fh, fw, C = feat.shape[1], feat.shape[2], feat.shape[3]
    Np = fh * fw
    K = class_im1_nchw.shape[1]

    # nn.Upsample(size=(H, W), mode='nearest') replicates each pooled feature
    # over a block, so the loss is identical if we instead SUM the class weights
    # within each block and evaluate at pooled resolution (glue, cheap).
    ri = (jnp.arange(H) * fh) // H
    ci = (jnp.arange(W) * fw) // W
    Ph = (ri[:, None] == jnp.arange(fh)[None, :]).astype(jnp.float32)   # (H, fh)
    Pw = (ci[:, None] == jnp.arange(fw)[None, :]).astype(jnp.float32)   # (W, fw)
    wp = jnp.einsum('bkhw,hp->bkpw', class_im1_nchw.astype(jnp.float32), Ph)
    wp = jnp.einsum('bkpw,wq->bkpq', wp, Pw).reshape(B, K, Np)

    feats = feat.reshape(B, Np, C)              # NHWC order — no HBM transpose

    TN = 512 if Np >= 1024 else 128
    N_pad = _round_up(Np, TN)
    if N_pad != Np:                             # zero weight padding contributes 0
        feats = jnp.pad(feats, ((0, 0), (0, N_pad - Np), (0, 0)))
        wp = jnp.pad(wp, ((0, 0), (0, 0), (0, N_pad - Np)))

    # normalization matches: sum_k mean_{b,n at FULL res}(err) / K
    inv_norm = 1.0 / float(B * K * H * W)

    loss = pl.pallas_call(
        _make_feature_loss_kernel(inv_norm),
        out_shape=jax.ShapeDtypeStruct((1, 1), jnp.float32),
        grid=(N_pad // TN,),
        in_specs=[pl.BlockSpec((B, TN, C), lambda n: (0, n, 0)),
                  pl.BlockSpec((B, K, TN), lambda n: (0, 0, n))],
        out_specs=pl.BlockSpec(memory_space=pltpu.MemorySpace.SMEM),
        scratch_shapes=[pltpu.VMEM((B, K), jnp.float32),      # S0
                        pltpu.VMEM((B, K, C), jnp.float32),   # S1
                        pltpu.VMEM((B, K), jnp.float32)],     # S2
        compiler_params=pltpu.CompilerParams(
            dimension_semantics=("arbitrary",),
            vmem_limit_bytes=32 * 1024 * 1024),
    )(feats, wp)
    return loss.reshape(1)


# ---------------------------- pure-JAX reference ---------------------------

def reference_loss(img1, class_im1, w_fold, bias):
    B, _, H, W = img1.shape
    y = lax.conv_general_dilated(img1, w_fold, (2, 2), ((3, 3), (3, 3)),
                                 dimension_numbers=('NCHW', 'OIHW', 'NCHW'),
                                 precision=lax.Precision.HIGHEST)
    y = jnp.maximum(y + bias[None, :, None, None], 0.0)
    y = lax.reduce_window(y, -jnp.inf, lax.max, (1, 1, 3, 3), (1, 1, 2, 2),
                          [(0, 0), (0, 0), (1, 1), (1, 1)])
    fh, fw = y.shape[2], y.shape[3]
    ri = (jnp.arange(H) * fh) // H
    ci = (jnp.arange(W) * fw) // W
    y = y[:, :, ri][:, :, :, ci]
    C = y.shape[1]
    feats = y.reshape(B, C, -1)
    K = class_im1.shape[1]
    total = jnp.zeros((1,), jnp.float32)
    for i in range(K):
        w = class_im1[:, i:i + 1].reshape(B, 1, -1)
        mean_feat = (feats * w).sum(axis=2, keepdims=True) / w.sum(axis=2, keepdims=True)
        err = ((feats - mean_feat) ** 2).sum(axis=1, keepdims=True) * w
        total = total + err.mean(axis=2).mean()
    return total / float(K)


# --------------------------------- main ------------------------------------

if __name__ == "__main__":
    B, Cin, H, W = 2, 3, 64, 64
    K = 4  # num_classes (small test size)

    key = jax.random.PRNGKey(0)
    k1, k2, k3, k4, k5, k6 = jax.random.split(key, 6)
    img1 = jax.random.normal(k1, (B, Cin, H, W), jnp.float32)
    # strictly positive class weight maps (real soft masks are >= 0)
    class_im1 = jax.random.uniform(k2, (B, K, H, W), jnp.float32,
                                   minval=0.05, maxval=1.0)

    # deterministic synthetic "resnet18 conv1 + bn1" parameters
    # TODO(synk): pretrained resnet18 checkpoint not loadable here; weights are synthetic.
    conv_w = jax.random.normal(k3, (64, Cin, 7, 7), jnp.float32) * 0.05
    gamma = jax.random.uniform(k4, (64,), jnp.float32, minval=0.5, maxval=1.5)
    beta = jax.random.normal(k5, (64,), jnp.float32) * 0.1
    rmean = jax.random.normal(k6, (64,), jnp.float32) * 0.1
    rvar = jnp.ones((64,), jnp.float32)

    scale = gamma / jnp.sqrt(rvar + 1e-5)
    w_fold = conv_w * scale[:, None, None, None]          # BN folded into conv
    bias = beta - rmean * scale
    wmat = jnp.transpose(w_fold, (2, 3, 1, 0)).reshape(7 * 7 * Cin, 64)

    loss = jax.jit(feature_loss)(img1, class_im1, wmat, bias)
    loss = jax.block_until_ready(loss)

    ref = reference_loss(img1, class_im1, w_fold, bias)
    assert np.allclose(np.asarray(loss), np.asarray(ref), rtol=2e-2, atol=1e-4), \
        (np.asarray(loss), np.asarray(ref))

    print("KERNEL_OK")
</pallas_src>

<mosaic_0001>
module attributes {stable_mosaic.version = 11 : i64} {
  func.func @_conv_mm_kernel(%arg0: i32, %arg1: memref<512x147xbf16, #tpu.memory_space<vmem>>, %arg2: memref<147x64xbf16, #tpu.memory_space<vmem>>, %arg3: memref<1x64xf32, #tpu.memory_space<vmem>>, %arg4: memref<512x64xbf16, #tpu.memory_space<vmem>>) attributes {dimension_semantics = [#tpu.dimension_semantics<parallel>], iteration_bounds = array<i64: 4>, scalar_prefetch = 0 : i64, scratch_operands = 0 : i64, tpu.core_type = #tpu.core_type<tc>, window_params = [{transform_indices = @transform_0, window_bounds = array<i64: 512, 147>}, {pipeline_mode = #tpu.pipeline_mode<synchronous>, transform_indices = @transform_1, window_bounds = array<i64: 147, 64>}, {pipeline_mode = #tpu.pipeline_mode<synchronous>, transform_indices = @transform_2, window_bounds = array<i64: 1, 64>}, {transform_indices = @transform_3, window_bounds = array<i64: 512, 64>}]} {
    %c0 = arith.constant 0 : index
    %c0_0 = arith.constant 0 : index
    %0 = vector.load %arg1[%c0, %c0_0] : memref<512x147xbf16, #tpu.memory_space<vmem>>, vector<512x147xbf16>
    %c0_1 = arith.constant 0 : index
    %c0_2 = arith.constant 0 : index
    %1 = vector.load %arg2[%c0_1, %c0_2] : memref<147x64xbf16, #tpu.memory_space<vmem>>, vector<147x64xbf16>
    %cst = arith.constant dense<0.000000e+00> : vector<512x64xf32>
    %2 = tpu.matmul %0, %1, %cst {dimension_numbers = #tpu.dot_dimension_numbers<[1], [0], [0], [1], [0, 0, 1, 1], [], []>} : vector<512x147xbf16>, vector<147x64xbf16>, vector<512x64xf32> -> vector<512x64xf32>
    %c0_3 = arith.constant 0 : index
    %c0_4 = arith.constant 0 : index
    %3 = vector.load %arg3[%c0_3, %c0_4] : memref<1x64xf32, #tpu.memory_space<vmem>>, vector<1x64xf32>
    %4 = vector.broadcast %3 : vector<1x64xf32> to vector<512x64xf32>
    %5 = arith.addf %2, %4 : vector<512x64xf32>
    %cst_5 = arith.constant 0.000000e+00 : f32
    %6 = vector.broadcast %cst_5 : f32 to vector<512x64xf32>
    %7 = arith.maximumf %5, %6 : vector<512x64xf32>
    %8 = arith.truncf %7 : vector<512x64xf32> to vector<512x64xbf16>
    %c0_6 = arith.constant 0 : index
    %c0_7 = arith.constant 0 : index
    %9 = vector.load %arg4[%c0_6, %c0_7] : memref<512x64xbf16, #tpu.memory_space<vmem>>, vector<512x64xbf16>
    tpu.vector_store %arg4[%c0_6, %c0_7], %8 {strides = array<i32>} : memref<512x64xbf16, #tpu.memory_space<vmem>>, vector<512x64xbf16>,
    return
  }
  func.func @transform_0(%arg0: i32) -> (i32, i32) {
    %c0_i32 = arith.constant 0 : i32
    %c0_i32_0 = arith.constant 0 : i32
    return %arg0, %c0_i32 : i32, i32
  }
  func.func @transform_1(%arg0: i32) -> (i32, i32) {
    %c0_i32 = arith.constant 0 : i32
    %c0_i32_0 = arith.constant 0 : i32
    %c0_i32_1 = arith.constant 0 : i32
    return %c0_i32, %c0_i32_0 : i32, i32
  }
  func.func @transform_2(%arg0: i32) -> (i32, i32) {
    %c0_i32 = arith.constant 0 : i32
    %c0_i32_0 = arith.constant 0 : i32
    %c0_i32_1 = arith.constant 0 : i32
    return %c0_i32, %c0_i32_0 : i32, i32
  }
  func.func @transform_3(%arg0: i32) -> (i32, i32) {
    %c0_i32 = arith.constant 0 : i32
    %c0_i32_0 = arith.constant 0 : i32
    return %arg0, %c0_i32 : i32, i32
  }
}

module attributes {stable_mosaic.version = 11 : i64} {
  func.func @kernel(%arg0: i32, %arg1: memref<2x128x64xbf16, #tpu.memory_space<vmem>>, %arg2: memref<2x4x128xf32, #tpu.memory_space<vmem>>, %arg3: memref<1x1xf32, #tpu.memory_space<smem>>, %arg4: memref<2x4xf32, #tpu.memory_space<vmem>>, %arg5: memref<2x4x64xf32, #tpu.memory_space<vmem>>, %arg6: memref<2x4xf32, #tpu.memory_space<vmem>>) attributes {dimension_semantics = [#tpu.dimension_semantics<arbitrary>], iteration_bounds = array<i64: 2>, scalar_prefetch = 0 : i64, scratch_operands = 3 : i64, tpu.core_type = #tpu.core_type<tc>, window_params = [{transform_indices = @transform_0, window_bounds = array<i64: 2, 128, 64>}, {transform_indices = @transform_1, window_bounds = array<i64: 2, 4, 128>}, {transform_indices = @transform_2, window_bounds = array<i64: 1, 1>}]} {
    %c0_i32 = arith.constant 0 : i32
    %0 = arith.cmpi eq, %arg0, %c0_i32 : i32
    %1 = arith.extui %0 : i1 to i32
    %c0_i32_0 = arith.constant 0 : i32
    %2 = arith.cmpi ne, %1, %c0_i32_0 : i32
    scf.if %2 {
      %cst_24 = arith.constant 0.000000e+00 : f32
      %27 = vector.broadcast %cst_24 : f32 to vector<2x4xf32>
      %c0_25 = arith.constant 0 : index
      %c0_26 = arith.constant 0 : index
      %28 = vector.load %arg4[%c0_25, %c0_26] : memref<2x4xf32, #tpu.memory_space<vmem>>, vector<2x4xf32>
      tpu.vector_store %arg4[%c0_25, %c0_26], %27 {strides = array<i32>} : memref<2x4xf32, #tpu.memory_space<vmem>>, vector<2x4xf32>,
      %cst_27 = arith.constant 0.000000e+00 : f32
      %29 = vector.broadcast %cst_27 : f32 to vector<2x4x64xf32>
      %c0_28 = arith.constant 0 : index
      %c0_29 = arith.constant 0 : index
      %c0_30 = arith.constant 0 : index
      %30 = vector.load %arg5[%c0_28, %c0_29, %c0_30] : memref<2x4x64xf32, #tpu.memory_space<vmem>>, vector<2x4x64xf32>
      tpu.vector_store %arg5[%c0_28, %c0_29, %c0_30], %29 {strides = array<i32>} : memref<2x4x64xf32, #tpu.memory_space<vmem>>, vector<2x4x64xf32>,
      %cst_31 = arith.constant 0.000000e+00 : f32
      %31 = vector.broadcast %cst_31 : f32 to vector<2x4xf32>
      %c0_32 = arith.constant 0 : index
      %c0_33 = arith.constant 0 : index
      %32 = vector.load %arg6[%c0_32, %c0_33] : memref<2x4xf32, #tpu.memory_space<vmem>>, vector<2x4xf32>
      tpu.vector_store %arg6[%c0_32, %c0_33], %31 {strides = array<i32>} : memref<2x4xf32, #tpu.memory_space<vmem>>, vector<2x4xf32>,
    } else {
    }
    %c0 = arith.constant 0 : index
    %c0_1 = arith.constant 0 : index
    %c0_2 = arith.constant 0 : index
    %3 = vector.load %arg1[%c0, %c0_1, %c0_2] : memref<2x128x64xbf16, #tpu.memory_space<vmem>>, vector<2x128x64xbf16>
    %4 = arith.extf %3 : vector<2x128x64xbf16> to vector<2x128x64xf32>
    %c0_3 = arith.constant 0 : index
    %c0_4 = arith.constant 0 : index
    %c0_5 = arith.constant 0 : index
    %5 = vector.load %arg2[%c0_3, %c0_4, %c0_5] : memref<2x4x128xf32, #tpu.memory_space<vmem>>, vector<2x4x128xf32>
    %6 = arith.truncf %5 : vector<2x4x128xf32> to vector<2x4x128xbf16>
    %7 = arith.mulf %4, %4 : vector<2x128x64xf32>
    %cst = arith.constant dense<0.000000e+00> : vector<2x128xf32>
    %8 = vector.multi_reduction <add>, %7, %cst [2] : vector<2x128x64xf32> to vector<2x128xf32>
    %c0_6 = arith.constant 0 : index
    %c0_7 = arith.constant 0 : index
    %9 = vector.load %arg4[%c0_6, %c0_7] : memref<2x4xf32, #tpu.memory_space<vmem>>, vector<2x4xf32>
    %cst_8 = arith.constant dense<0.000000e+00> : vector<2x4xf32>
    %10 = vector.multi_reduction <add>, %5, %cst_8 [2] : vector<2x4x128xf32> to vector<2x4xf32>
    %11 = arith.addf %9, %10 : vector<2x4xf32>
    %c0_9 = arith.constant 0 : index
    %c0_10 = arith.constant 0 : index
    %12 = vector.load %arg4[%c0_9, %c0_10] : memref<2x4xf32, #tpu.memory_space<vmem>>, vector<2x4xf32>
    tpu.vector_store %arg4[%c0_9, %c0_10], %11 {strides = array<i32>} : memref<2x4xf32, #tpu.memory_space<vmem>>, vector<2x4xf32>,
    %c0_11 = arith.constant 0 : index
    %c0_12 = arith.constant 0 : index
    %c0_13 = arith.constant 0 : index
    %13 = vector.load %arg5[%c0_11, %c0_12, %c0_13] : memref<2x4x64xf32, #tpu.memory_space<vmem>>, vector<2x4x64xf32>
    "tpu.trace_start"() <{level = 10 : i32, message = "bkn,bnc->bkc"}> : () -> ()
    %cst_14 = arith.constant dense<0.000000e+00> : vector<2x4x64xf32>
    %14 = tpu.matmul %6, %3, %cst_14 {dimension_numbers = #tpu.dot_dimension_numbers<[2], [1], [1], [2], [0, 0, 0, 1, 1, 2], [0], [0]>} : vector<2x4x128xbf16>, vector<2x128x64xbf16>, vector<2x4x64xf32> -> vector<2x4x64xf32>
    "tpu.trace_stop"() : () -> ()
    %15 = arith.addf %13, %14 : vector<2x4x64xf32>
    %c0_15 = arith.constant 0 : index
    %c0_16 = arith.constant 0 : index
    %c0_17 = arith.constant 0 : index
    %16 = vector.load %arg5[%c0_15, %c0_16, %c0_17] : memref<2x4x64xf32, #tpu.memory_space<vmem>>, vector<2x4x64xf32>
    tpu.vector_store %arg5[%c0_15, %c0_16, %c0_17], %15 {strides = array<i32>} : memref<2x4x64xf32, #tpu.memory_space<vmem>>, vector<2x4x64xf32>,
    %c0_18 = arith.constant 0 : index
    %c0_19 = arith.constant 0 : index
    %17 = vector.load %arg6[%c0_18, %c0_19] : memref<2x4xf32, #tpu.memory_space<vmem>>, vector<2x4xf32>
    %18 = vector.shape_cast %8 : vector<2x128xf32> to vector<2x1x128xf32>
    %19 = vector.broadcast %18 : vector<2x1x128xf32> to vector<2x4x128xf32>
    %20 = arith.mulf %5, %19 : vector<2x4x128xf32>
    %cst_20 = arith.constant dense<0.000000e+00> : vector<2x4xf32>
    %21 = vector.multi_reduction <add>, %20, %cst_20 [2] : vector<2x4x128xf32> to vector<2x4xf32>
    %22 = arith.addf %17, %21 : vector<2x4xf32>
    %c0_21 = arith.constant 0 : index
    %c0_22 = arith.constant 0 : index
    %23 = vector.load %arg6[%c0_21, %c0_22] : memref<2x4xf32, #tpu.memory_space<vmem>>, vector<2x4xf32>
    tpu.vector_store %arg6[%c0_21, %c0_22], %22 {strides = array<i32>} : memref<2x4xf32, #tpu.memory_space<vmem>>, vector<2x4xf32>,
    %c1_i32 = arith.constant 1 : i32
    %24 = arith.cmpi eq, %arg0, %c1_i32 : i32
    %25 = arith.extui %24 : i1 to i32
    %c0_i32_23 = arith.constant 0 : i32
    %26 = arith.cmpi ne, %25, %c0_i32_23 : i32
    scf.if %26 {
      %c0_24 = arith.constant 0 : index
      %c0_25 = arith.constant 0 : index
      %27 = vector.load %arg4[%c0_24, %c0_25] : memref<2x4xf32, #tpu.memory_space<vmem>>, vector<2x4xf32>
      %c0_26 = arith.constant 0 : index
      %c0_27 = arith.constant 0 : index
      %c0_28 = arith.constant 0 : index
      %28 = vector.load %arg5[%c0_26, %c0_27, %c0_28] : memref<2x4x64xf32, #tpu.memory_space<vmem>>, vector<2x4x64xf32>
      %c0_29 = arith.constant 0 : index
      %c0_30 = arith.constant 0 : index
      %29 = vector.load %arg6[%c0_29, %c0_30] : memref<2x4xf32, #tpu.memory_space<vmem>>, vector<2x4xf32>
      %cst_31 = arith.constant 0.000000e+00 : f32
      %30 = vector.broadcast %cst_31 : f32 to vector<2x4xf32>
      %31 = arith.cmpf ogt, %27, %30 : vector<2x4xf32>
      %cst_32 = arith.constant 1.000000e+00 : f32
      %32 = vector.broadcast %cst_32 : f32 to vector<2x4xf32>
      %33 = arith.select %31, %27, %32 : vector<2x4xi1>, vector<2x4xf32>
      %34 = arith.mulf %28, %28 : vector<2x4x64xf32>
      %cst_33 = arith.constant dense<0.000000e+00> : vector<2x4xf32>
      %35 = vector.multi_reduction <add>, %34, %cst_33 [2] : vector<2x4x64xf32> to vector<2x4xf32>
      %36 = arith.divf %35, %33 : vector<2x4xf32>
      %37 = arith.subf %29, %36 : vector<2x4xf32>
      %38 = vector.shape_cast %37 : vector<2x4xf32> to vector<1x2x4xf32>
      %cst_34 = arith.constant dense<0.000000e+00> : vector<1xf32>
      %39 = vector.multi_reduction <add>, %38, %cst_34 [1, 2] : vector<1x2x4xf32> to vector<1xf32>
      %40 = vector.shape_cast %39 : vector<1xf32> to vector<1x1x1xf32>
      %41 = vector.extract %40[0, 0, 0] : f32 from vector<1x1x1xf32>
      %cst_35 = arith.constant 3.05175781E-5 : f32
      %42 = arith.mulf %41, %cst_35 : f32
      %c0_36 = arith.constant 0 : index
      %c0_37 = arith.constant 0 : index
      %43 = memref.load %arg3[%c0_36, %c0_37] : memref<1x1xf32, #tpu.memory_space<smem>>
      memref.store %42, %arg3[%c0_36, %c0_37] : memref<1x1xf32, #tpu.memory_space<smem>>
    } else {
    }
    return
  }
  func.func @transform_0(%arg0: i32) -> (i32, i32, i32) {
    %c0_i32 = arith.constant 0 : i32
    %c0_i32_0 = arith.constant 0 : i32
    %c0_i32_1 = arith.constant 0 : i32
    return %c0_i32, %arg0, %c0_i32_0 : i32, i32, i32
  }
  func.func @transform_1(%arg0: i32) -> (i32, i32, i32) {
    %c0_i32 = arith.constant 0 : i32
    %c0_i32_0 = arith.constant 0 : i32
    %c0_i32_1 = arith.constant 0 : i32
    return %c0_i32, %c0_i32_0, %arg0 : i32, i32, i32
  }
  func.func @transform_2(%arg0: i32) -> (i32, i32) {
    %c0_i32 = arith.constant 0 : i32
    %c0_i32_0 = arith.constant 0 : i32
    %c0_i32_1 = arith.constant 0 : i32
    return %c0_i32, %c0_i32_0 : i32, i32
  }
}

</mosaic_0001>

<bundles_post_ra>
// kernel: feature_loss.2
= control target key start
LH: loop header
LB: loop body
LE: loop exit
PB: predicated region body
PF: predicated region fallthrough
CT: control target
= control target key end

     0   :  { %s1861_s12 = smov 0   ;;  %s2209_s0 = inlined_call_operand.vmem [shape: bf16[2048,147], index: 0, kind: input, shape index: {}]   ;;  %s2210_s1 = inlined_call_operand.vmem [shape: bf16[147,64], index: 1, kind: input, shape index: {}]   ;;  %s2211_s2 = inlined_call_operand.vmem [shape: f32[1,64], index: 2, kind: input, shape index: {}]   ;;  %s2212_s3 = inlined_call_operand.vmem [shape: bf16[2048,64], index: 3, kind: output, shape index: {}]  }
   0x1 LB: > { %s1447_s13 = sadd.s32 4294967295, %s1837_s12   ;;  %p1451_p0 = scmp.ge.s32.totalorder %s1837_s12, 1  ;;  %s1837_s12 = sphi %s1861_s12, %s13_s12  }
   0x2   : > { %p139_p1 = scmp.lt.s32.totalorder %s1837_s12, 5 }
   0x4   : > { %p140_p2 = pnand %p1451_p0, %p139_p1 }
   0x5   : > { %v1725_v0 = vld [vmem:[%s2210_s1] sm:$0xff] (!%p140_p2)   ;;  %v1839_v1 = vmov (!%p140_p2), 0   ;;  %v1726_v2 = vld [vmem:[%s2210_s1 + $0x8] sm:$0xff] (!%p140_p2)   ;;  %v1727_v3 = vld [vmem:[%s2210_s1 + $0x10] sm:$0xff] (!%p140_p2)   ;;  %s1452_s20 = sshll.u32 (!%p140_p2), %s1447_s13, 6  ;;  %vm613_vm0 = vcmask (!%p140_p2), 154624  }
   0x6   : > { %143 = sbr.rel (%p140_p2) target bundleno = 387 (0x183), region = 32  ;;  %717 = vmatprep.subr.bf16.mxu0 (!%p140_p2), %v1839_v1  ;;  %1695 = vmatprep.subr.bf16.mxu1 (!%p140_p2), %v1839_v1  ;;  %p165_p3 = scmp.lt.s32.totalorder (!%p140_p2), %s1452_s20, 255  ;;  %v1728_v4 = vld [vmem:[%s2210_s1 + $0x18] sm:$0xff] (!%p140_p2)   ;;  %v1729_v5 = vld [vmem:[%s2210_s1 + $0x20] sm:$0xff] (!%p140_p2)   ;;  %v1730_v8 = vld [vmem:[%s2210_s1 + $0x28] sm:$0xff] (!%p140_p2)   ;;  %vm710_vm1 = vcmask (!%p140_p2), 1040384  }
   0x7   : > { %718 = vmatpush1.bf16.msra.mxu0 (!%p140_p2), %v1725_v0  ;;  %1705 = vmatpush1.bf16.msra.mxu1 (!%p140_p2), %v1725_v0  ;;  %v1731_v9 = vld [vmem:[%s2210_s1 + $0x30] sm:$0xff] (!%p140_p2)   ;;  %v1732_v10 = vld [vmem:[%s2210_s1 + $0x38] sm:$0xff] (!%p140_p2)   ;;  %vm711_vm2 = vcmask (!%p140_p2), 1041408   ;;  %v1840_v11 = vmov (!%p140_p2), 65535   ;;  %v1733_v13 = vld [vmem:[%s2210_s1 + $0x40] sm:$0xff] (!%p140_p2)   ;;  %vm1326_vm3 = vcmask (!%p140_p2), 519168  }
   0x8   : > { %719 = vmatprep.subr.bf16.mxu0 (!%p140_p2), %v1839_v1  ;;  %1696 = vmatprep.subr.bf16.mxu1 (!%p140_p2), %v1839_v1  ;;  %v712_v12 = vsel (!%p140_p2), %vm710_vm1, 4294967295, %v1840_v11  ;;  %v1734_v14 = vld [vmem:[%s2210_s1 + $0x48] ss:$0 sps:$4 sm:$0x33] (!%p140_p2)  }
   0x9   : > { %v713_v15 = vsel (!%p140_p2), %vm711_vm2, %v712_v12, 0 }
   0xa   : > { %v715_v16 = vand.u32 (!%p140_p2), %v1734_v14, %v713_v15  ;;  %v2006_v15 = vld [vmem:[%s2211_s2] ss:$0 sm:$0xff] (!%p140_p2) }
   0xb   : > { %720 = vmatpush1.bf16.msra.mxu0 (!%p140_p2), %v1726_v2  ;;  %1706 = vmatpush1.bf16.msra.mxu1 (!%p140_p2), %v1726_v2 }
   0xc   : > { %721 = vmatprep.subr.bf16.mxu0 (!%p140_p2), %v1839_v1  ;;  %1697 = vmatprep.subr.bf16.mxu1 (!%p140_p2), %v1839_v1 }
   0xd   : > { %s2214_s20 = smov (!%p165_p3, %s1452_s20), 255 }
   0xe   : > { %s1630_s23 = sshll.u32 %s2214_s20, 3  ;;  %s1456_s15 = sshll.u32 %s2214_s20, 2 }
   0xf   : > { %722 = vmatpush1.bf16.msra.mxu0 %v1727_v3  ;;  %1707 = vmatpush1.bf16.msra.mxu1 %v1727_v3  ;;  %s1887_s26 = scalar_lea.vmem %s2209_s0, %s1630_s23  ;;  %s2016_s18 = scalar_lea.vmem %s2212_s3, %s1456_s15 }
  0x10   : > { %723 = vmatprep.subr.bf16.mxu0 %v1839_v1  ;;  %1698 = vmatprep.subr.bf16.mxu1 %v1839_v1  ;;  %v1737_v6 = vld [vmem:[%s1887_s26 + $0x4] ss:$8 sps:$4 sm:$0xff]   ;;  %v1735_v17 = vld [vmem:[%s1887_s26] ss:$8 sps:$4 sm:$0xff]   ;;  %v1741_v19 = vld [vmem:[%s1887_s26 + $0x14] ss:$8 sps:$4 sm:$0xff]  }
  0x11   : > { %v1740_v7 = vld [vmem:[%s1887_s26 + $0x104] ss:$8 sps:$4 sm:$0xff]   ;;  %1532 = vmatprep.mubr.msk.bf16.mxu0 %vm613_vm0, %v1737_v6  ;;  %v1738_v18 = vld [vmem:[%s1887_s26 + $0x100] ss:$8 sps:$4 sm:$0xff]   ;;  %v1743_v20 = vld [vmem:[%s1887_s26 + $0x114] ss:$8 sps:$4 sm:$0xff]  }
  0x12   : > { %1548 = vmatprep.mubr.msk.bf16.mxu1 %vm613_vm0, %v1740_v7  ;;  %v1745_v21 = vld [vmem:[%s1887_s26 + $0x10] ss:$8 sps:$4 sm:$0xff]   ;;  %v1747_v23 = vld [vmem:[%s1887_s26 + $0x24] ss:$8 sps:$4 sm:$0xff]   ;;  %v1751_v25 = vld [vmem:[%s1887_s26 + $0x20] ss:$8 sps:$4 sm:$0xff]  }
  0x13   : > { %724 = vmatpush1.bf16.msra.mxu0 %v1728_v4  ;;  %1708 = vmatpush1.bf16.msra.mxu1 %v1728_v4  ;;  %v1746_v22 = vld [vmem:[%s1887_s26 + $0x110] ss:$8 sps:$4 sm:$0xff]   ;;  %v1749_v24 = vld [vmem:[%s1887_s26 + $0x124] ss:$8 sps:$4 sm:$0xff]   ;;  %v1752_v26 = vld [vmem:[%s1887_s26 + $0x120] ss:$8 sps:$4 sm:$0xff]  }
  0x14   : > { %725 = vmatprep.subr.bf16.mxu0 %v1839_v1  ;;  %1699 = vmatprep.subr.bf16.mxu1 %v1839_v1  ;;  %v1753_v27 = vld [vmem:[%s1887_s26 + $0x34] ss:$8 sps:$4 sm:$0xff]   ;;  %v1757_v29 = vld [vmem:[%s1887_s26 + $0x30] ss:$8 sps:$4 sm:$0xff]   ;;  %v1759_v31 = vld [vmem:[%s1887_s26 + $0x44] ss:$8 sps:$4 sm:$0xff]  }
  0x15   : > { %v1755_v28 = vld [vmem:[%s1887_s26 + $0x134] ss:$8 sps:$4 sm:$0xff]   ;;  %v1758_v30 = vld [vmem:[%s1887_s26 + $0x130] ss:$8 sps:$4 sm:$0xff]   ;;  %v1761_v32 = vld [vmem:[%s1887_s26 + $0x144] ss:$8 sps:$4 sm:$0xff]  }
  0x16   : > { %v1763_v33 = vld [vmem:[%s1887_s26 + $0x40] ss:$8 sps:$4 sm:$0xff]   ;;  %v1765_v35 = vld [vmem:[%s1887_s26 + $0x54] ss:$8 sps:$4 sm:$0xff]   ;;  %v1769_v37 = vld [vmem:[%s1887_s26 + $0x50] ss:$8 sps:$4 sm:$0xff]  }
  0x17   : > { %726 = vmatpush1.bf16.msra.mxu0 %v1729_v5  ;;  %1709 = vmatpush1.bf16.msra.mxu1 %v1729_v5  ;;  %v1764_v34 = vld [vmem:[%s1887_s26 + $0x140] ss:$8 sps:$4 sm:$0xff]   ;;  %v1767_v36 = vld [vmem:[%s1887_s26 + $0x154] ss:$8 sps:$4 sm:$0xff]   ;;  %v1770_v38 = vld [vmem:[%s1887_s26 + $0x150] ss:$8 sps:$4 sm:$0xff]  }
  0x18   : > { %727 = vmatprep.subr.bf16.mxu0 %v1839_v1  ;;  %1700 = vmatprep.subr.bf16.mxu1 %v1839_v1  ;;  %v1771_v39 = vld [vmem:[%s1887_s26 + $0x64] ss:$8 sps:$4 sm:$0xff]   ;;  %v1775_v41 = vld [vmem:[%s1887_s26 + $0x60] ss:$8 sps:$4 sm:$0xff]   ;;  %v1777_v43 = vld [vmem:[%s1887_s26 + $0x74] ss:$8 sps:$4 sm:$0xff]  }
  0x19   : > { %v1773_v40 = vld [vmem:[%s1887_s26 + $0x164] ss:$8 sps:$4 sm:$0xff]   ;;  %v1776_v42 = vld [vmem:[%s1887_s26 + $0x160] ss:$8 sps:$4 sm:$0xff]   ;;  %v1779_v44 = vld [vmem:[%s1887_s26 + $0x174] ss:$8 sps:$4 sm:$0xff]  }
  0x1a   : > { %v1781_v45 = vld [vmem:[%s1887_s26 + $0x70] ss:$8 sps:$4 sm:$0xff]   ;;  %v1783_v47 = vld [vmem:[%s1887_s26 + $0x84] ss:$8 sps:$4 sm:$0xff]   ;;  %v1787_v49 = vld [vmem:[%s1887_s26 + $0x80] ss:$8 sps:$4 sm:$0xff]  }
  0x1b   : > { %728 = vmatpush1.bf16.msra.mxu0 %v1730_v8  ;;  %1710 = vmatpush1.bf16.msra.mxu1 %v1730_v8  ;;  %v1782_v46 = vld [vmem:[%s1887_s26 + $0x170] ss:$8 sps:$4 sm:$0xff]   ;;  %v1785_v48 = vld [vmem:[%s1887_s26 + $0x184] ss:$8 sps:$4 sm:$0xff]   ;;  %v1788_v50 = vld [vmem:[%s1887_s26 + $0x180] ss:$8 sps:$4 sm:$0xff]  }
  0x1c   : > { %729 = vmatprep.subr.bf16.mxu0 %v1839_v1  ;;  %1701 = vmatprep.subr.bf16.mxu1 %v1839_v1  ;;  %v1789_v51 = vld [vmem:[%s1887_s26 + $0x94] ss:$8 sps:$4 sm:$0xff]   ;;  %v1793_v53 = vld [vmem:[%s1887_s26 + $0x90] ss:$8 sps:$4 sm:$0xff]   ;;  %v1795_v55 = vld [vmem:[%s1887_s26 + $0xa4] ss:$8 sps:$4 sm:$0xff]  }
  0x1d   : > { %v1791_v52 = vld [vmem:[%s1887_s26 + $0x194] ss:$8 sps:$4 sm:$0xff]   ;;  %v1794_v54 = vld [vmem:[%s1887_s26 + $0x190] ss:$8 sps:$4 sm:$0xff]   ;;  %v1797_v56 = vld [vmem:[%s1887_s26 + $0x1a4] ss:$8 sps:$4 sm:$0xff]  }
  0x1e   : > { %v1799_v57 = vld [vmem:[%s1887_s26 + $0xa0] ss:$8 sps:$4 sm:$0xff]   ;;  %v1801_v59 = vld [vmem:[%s1887_s26 + $0xb4] ss:$8 sps:$4 sm:$0xff]   ;;  %v1805_v61 = vld [vmem:[%s1887_s26 + $0xb0] ss:$8 sps:$4 sm:$0xff]  }
  0x1f   : > { %730 = vmatpush1.bf16.msra.mxu0 %v1731_v9  ;;  %1711 = vmatpush1.bf16.msra.mxu1 %v1731_v9  ;;  %v1800_v58 = vld [vmem:[%s1887_s26 + $0x1a0] ss:$8 sps:$4 sm:$0xff]   ;;  %v1803_v60 = vld [vmem:[%s1887_s26 + $0x1b4] ss:$8 sps:$4 sm:$0xff]   ;;  %v1806_v62 = vld [vmem:[%s1887_s26 + $0x1b0] ss:$8 sps:$4 sm:$0xff]  }
  0x20   : > { %731 = vmatprep.subr.bf16.mxu0 %v1839_v1  ;;  %1702 = vmatprep.subr.bf16.mxu1 %v1839_v1  ;;  %v1807_v63 = vld [vmem:[%s1887_s26 + $0xc4] ss:$8 sps:$4 sm:$0xff]   ;;  %v1812_v2 = vld [vmem:[%s1887_s26 + $0x1c0] ss:$8 sps:$4 sm:$0xff]   ;;  %v1813_v3 = vld [vmem:[%s1887_s26 + $0xd4] ss:$8 sps:$4 sm:$0xff]  }
  0x21   : > { %v1809_v0 = vld [vmem:[%s1887_s26 + $0x1c4] ss:$8 sps:$4 sm:$0xff]   ;;  %v1815_v4 = vld [vmem:[%s1887_s26 + $0x1d4] ss:$8 sps:$4 sm:$0xff]   ;;  %v1817_v5 = vld [vmem:[%s1887_s26 + $0xd0] ss:$8 sps:$4 sm:$0xff]  }
  0x22   : > { %v1818_v6 = vld [vmem:[%s1887_s26 + $0x1d0] ss:$8 sps:$4 sm:$0xff]   ;;  %v1819_v7 = vld [vmem:[%s1887_s26 + $0xe4] ss:$8 sps:$4 sm:$0xff]   ;;  %v1823_v9 = vld [vmem:[%s1887_s26 + $0xe0] ss:$8 sps:$4 sm:$0xff]  }
  0x23   : > { %732 = vmatpush1.bf16.msra.mxu0 %v1732_v10  ;;  %1712 = vmatpush1.bf16.msra.mxu1 %v1732_v10  ;;  %v1821_v8 = vld [vmem:[%s1887_s26 + $0x1e4] ss:$8 sps:$4 sm:$0xff]   ;;  %v1824_v10 = vld [vmem:[%s1887_s26 + $0x1e0] ss:$8 sps:$4 sm:$0xff]   ;;  %v1825_v11 = vld [vmem:[%s1887_s26 + $0xf4] ss:$8 sps:$4 sm:$0xff]  }
  0x24   : > { %733 = vmatprep.subr.bf16.mxu0 %v1839_v1  ;;  %1703 = vmatprep.subr.bf16.mxu1 %v1839_v1  ;;  %v1827_v12 = vld [vmem:[%s1887_s26 + $0x1f4] ss:$8 sps:$4 sm:$0xff]   ;;  %v1830_v14 = vld [vmem:[%s1887_s26 + $0x1f0] ss:$8 sps:$4 sm:$0xff]  }
  0x27   : > { %734 = vmatpush1.bf16.msra.mxu0 %v1733_v13  ;;  %1713 = vmatpush1.bf16.msra.mxu1 %v1733_v13  ;;  %v1829_v13 = vld [vmem:[%s1887_s26 + $0xf0] ss:$8 sps:$4 sm:$0xff]  }
  0x28   : > { %735 = vmatprep.subr.bf16.mxu0 %v1839_v1  ;;  %1704 = vmatprep.subr.bf16.mxu1 %v1839_v1  ;;  %v1811_v1 = vld [vmem:[%s1887_s26 + $0xc0] ss:$8 sps:$4 sm:$0xff]  }
  0x2b   : > { %736 = vmatpush1.bf16.msra.mxu0 %v715_v16  ;;  %1714 = vmatpush1.bf16.msra.mxu1 %v715_v16 }
  0x2e   : > { %750 = vmatmul.mubr.bf16.vlgmr.msra.gmra.mrb[0].mxu0 %v1735_v17  ;;  %878 = vmatmul.mubr.bf16.vlgmr.msra.gmra.mrb[0].mxu1 %v1738_v18 }
  0x2f   : > { %1533 = vmatprep.mubr.msk.bf16.mxu0 %vm613_vm0, %v1741_v19  ;;  %1549 = vmatprep.mubr.msk.bf16.mxu1 %vm613_vm0, %v1743_v20 }
  0x36   : > { %758 = vmatmul.mubr.bf16.gmra.mrb[4].mxu0 %v1745_v21  ;;  %886 = vmatmul.mubr.bf16.gmra.mrb[4].mxu1 %v1746_v22 }
  0x37   : > { %1534 = vmatprep.mubr.msk.bf16.mxu0 %vm613_vm0, %v1747_v23  ;;  %1550 = vmatprep.mubr.msk.bf16.mxu1 %vm613_vm0, %v1749_v24 }
  0x3e   : > { %766 = vmatmul.mubr.bf16.gmra.mrb[8].mxu0 %v1751_v25  ;;  %894 = vmatmul.mubr.bf16.gmra.mrb[8].mxu1 %v1752_v26 }
  0x3f   : > { %1535 = vmatprep.mubr.msk.bf16.mxu0 %vm613_vm0, %v1753_v27  ;;  %1551 = vmatprep.mubr.msk.bf16.mxu1 %vm613_vm0, %v1755_v28 }
  0x46   : > { %774 = vmatmul.mubr.bf16.gmra.mrb[12].mxu0 %v1757_v29  ;;  %902 = vmatmul.mubr.bf16.gmra.mrb[12].mxu1 %v1758_v30 }
  0x47   : > { %1536 = vmatprep.mubr.msk.bf16.mxu0 %vm613_vm0, %v1759_v31  ;;  %1552 = vmatprep.mubr.msk.bf16.mxu1 %vm613_vm0, %v1761_v32 }
  0x4e   : > { %782 = vmatmul.mubr.bf16.gmra.mrb[16].mxu0 %v1763_v33  ;;  %910 = vmatmul.mubr.bf16.gmra.mrb[16].mxu1 %v1764_v34 }
  0x4f   : > { %1537 = vmatprep.mubr.msk.bf16.mxu0 %vm613_vm0, %v1765_v35  ;;  %1553 = vmatprep.mubr.msk.bf16.mxu1 %vm613_vm0, %v1767_v36 }
  0x56   : > { %790 = vmatmul.mubr.bf16.gmra.mrb[20].mxu0 %v1769_v37  ;;  %918 = vmatmul.mubr.bf16.gmra.mrb[20].mxu1 %v1770_v38 }
  0x57   : > { %1538 = vmatprep.mubr.msk.bf16.mxu0 %vm613_vm0, %v1771_v39  ;;  %1554 = vmatprep.mubr.msk.bf16.mxu1 %vm613_vm0, %v1773_v40 }
  0x5e   : > { %798 = vmatmul.mubr.bf16.gmra.mrb[24].mxu0 %v1775_v41  ;;  %926 = vmatmul.mubr.bf16.gmra.mrb[24].mxu1 %v1776_v42 }
  0x5f   : > { %1539 = vmatprep.mubr.msk.bf16.mxu0 %vm613_vm0, %v1777_v43  ;;  %1555 = vmatprep.mubr.msk.bf16.mxu1 %vm613_vm0, %v1779_v44 }
  0x66   : > { %806 = vmatmul.mubr.bf16.gmra.mrb[28].mxu0 %v1781_v45  ;;  %934 = vmatmul.mubr.bf16.gmra.mrb[28].mxu1 %v1782_v46 }
  0x67   : > { %1540 = vmatprep.mubr.msk.bf16.mxu0 %vm613_vm0, %v1783_v47  ;;  %1556 = vmatprep.mubr.msk.bf16.mxu1 %vm613_vm0, %v1785_v48 }
  0x6e   : > { %814 = vmatmul.mubr.bf16.gmra.mrb[32].mxu0 %v1787_v49  ;;  %942 = vmatmul.mubr.bf16.gmra.mrb[32].mxu1 %v1788_v50 }
  0x6f   : > { %1541 = vmatprep.mubr.msk.bf16.mxu0 %vm613_vm0, %v1789_v51  ;;  %1557 = vmatprep.mubr.msk.bf16.mxu1 %vm613_vm0, %v1791_v52 }
  0x76   : > { %822 = vmatmul.mubr.bf16.gmra.mrb[36].mxu0 %v1793_v53  ;;  %950 = vmatmul.mubr.bf16.gmra.mrb[36].mxu1 %v1794_v54 }
  0x77   : > { %1542 = vmatprep.mubr.msk.bf16.mxu0 %vm613_vm0, %v1795_v55  ;;  %1558 = vmatprep.mubr.msk.bf16.mxu1 %vm613_vm0, %v1797_v56 }
  0x7e   : > { %830 = vmatmul.mubr.bf16.gmra.mrb[40].mxu0 %v1799_v57  ;;  %958 = vmatmul.mubr.bf16.gmra.mrb[40].mxu1 %v1800_v58 }
  0x7f   : > { %1543 = vmatprep.mubr.msk.bf16.mxu0 %vm613_vm0, %v1801_v59  ;;  %1559 = vmatprep.mubr.msk.bf16.mxu1 %vm613_vm0, %v1803_v60 }
  0x86   : > { %838 = vmatmul.mubr.bf16.gmra.mrb[44].mxu0 %v1805_v61  ;;  %966 = vmatmul.mubr.bf16.gmra.mrb[44].mxu1 %v1806_v62 }
  0x87   : > { %1544 = vmatprep.mubr.msk.bf16.mxu0 %vm613_vm0, %v1807_v63  ;;  %1560 = vmatprep.mubr.msk.bf16.mxu1 %vm613_vm0, %v1809_v0 }
  0x8e   : > { %846 = vmatmul.mubr.bf16.gmra.mrb[48].mxu0 %v1811_v1  ;;  %974 = vmatmul.mubr.bf16.gmra.mrb[48].mxu1 %v1812_v2 }
  0x8f   : > { %1545 = vmatprep.mubr.msk.bf16.mxu0 %vm613_vm0, %v1813_v3  ;;  %1561 = vmatprep.mubr.msk.bf16.mxu1 %vm613_vm0, %v1815_v4 }
  0x96   : > { %854 = vmatmul.mubr.bf16.gmra.mrb[52].mxu0 %v1817_v5  ;;  %982 = vmatmul.mubr.bf16.gmra.mrb[52].mxu1 %v1818_v6 }
  0x97   : > { %1546 = vmatprep.mubr.msk.bf16.mxu0 %vm613_vm0, %v1819_v7  ;;  %1562 = vmatprep.mubr.msk.bf16.mxu1 %vm613_vm0, %v1821_v8 }
  0x9e   : > { %862 = vmatmul.mubr.bf16.gmra.mrb[56].mxu0 %v1823_v9  ;;  %990 = vmatmul.mubr.bf16.gmra.mrb[56].mxu1 %v1824_v10 }
  0x9f   : > { %1547 = vmatprep.mubr.msk.bf16.mxu0 %vm613_vm0, %v1825_v11  ;;  %1563 = vmatprep.mubr.msk.bf16.mxu1 %vm613_vm0, %v1827_v12 }
  0xa6   : > { %870 = vmatmul.mubr.bf16.gmra.mrb[60].mxu0 %v1829_v13  ;;  %998 = vmatmul.mubr.bf16.gmra.mrb[60].mxu1 %v1830_v14 }
 0x101   : > { %v751_v16 = vpop.f32.mrb[0].mxu0  ;;  %v879_v17 = vpop.f32.mrb[0].mxu1 }
 0x102   : > { %v752_v18 = vadd.f32 %v2006_v15, %v751_v16  ;;  %v880_v19 = vadd.f32 %v2006_v15, %v879_v17  ;;  %v753_v20 = vpop.f32.mrb[1].mxu0  ;;  %v881_v21 = vpop.f32.mrb[1].mxu1 }
 0x103   : > { %v754_v22 = vpop.f32.mrb[2].mxu0  ;;  %v882_v23 = vpop.f32.mrb[2].mxu1 }
 0x104   : > { %v1006_v24 = vmax.f32 %v752_v18, 0.0  ;;  %v1038_v25 = vmax.f32 %v880_v19, 0.0  ;;  %v755_v26 = vadd.f32 %v2006_v15, %v754_v22  ;;  %v883_v27 = vadd.f32 %v2006_v15, %v882_v23  ;;  %v756_v28 = vpop.f32.mrb[3].mxu0  ;;  %v884_v29 = vpop.f32.mrb[3].mxu1 }
 0x106   : > { %v1631_v30 = vpack.c.bf16 %v1006_v24, %v1006_v24  ;;  %v1663_v31 = vpack.c.bf16 %v1038_v25, %v1038_v25  ;;  %v1007_v32 = vmax.f32 %v755_v26, 0.0  ;;  %v1039_v33 = vmax.f32 %v883_v27, 0.0 }
 0x108   : > { %1327 = vst.msk [vmem:[%s2016_s18] sm:$0xf] %vm1326_vm3, %v1631_v30  ;;  %1359 = vst.msk [vmem:[%s2016_s18 + $0x80] sm:$0xf] %vm1326_vm3, %v1663_v31  ;;  %v1632_v34 = vpack.c.bf16 %v1007_v32, %v1007_v32  ;;  %v1664_v35 = vpack.c.bf16 %v1039_v33, %v1039_v33 }
 0x109   : > { %v759_v36 = vpop.f32.mrb[4].mxu0  ;;  %v887_v37 = vpop.f32.mrb[4].mxu1 }
 0x10a   : > { %1328 = vst.msk [vmem:[%s2016_s18 + $0x4] sm:$0xf] %vm1326_vm3, %v1632_v34  ;;  %1360 = vst.msk [vmem:[%s2016_s18 + $0x84] sm:$0xf] %vm1326_vm3, %v1664_v35  ;;  %v760_v38 = vadd.f32 %v2006_v15, %v759_v36  ;;  %v888_v39 = vadd.f32 %v2006_v15, %v887_v37  ;;  %v761_v40 = vpop.f32.mrb[5].mxu0  ;;  %v889_v41 = vpop.f32.mrb[5].mxu1 }
 0x10b   : > { %v762_v42 = vpop.f32.mrb[6].mxu0  ;;  %v890_v43 = vpop.f32.mrb[6].mxu1 }
 0x10c   : > { %v1008_v44 = vmax.f32 %v760_v38, 0.0  ;;  %v1040_v45 = vmax.f32 %v888_v39, 0.0  ;;  %v763_v46 = vadd.f32 %v2006_v15, %v762_v42  ;;  %v891_v47 = vadd.f32 %v2006_v15, %v890_v43  ;;  %v764_v48 = vpop.f32.mrb[7].mxu0  ;;  %v892_v49 = vpop.f32.mrb[7].mxu1 }
 0x10e   : > { %v1633_v50 = vpack.c.bf16 %v1008_v44, %v1008_v44  ;;  %v1665_v51 = vpack.c.bf16 %v1040_v45, %v1040_v45  ;;  %v1009_v52 = vmax.f32 %v763_v46, 0.0  ;;  %v1041_v53 = vmax.f32 %v891_v47, 0.0 }
 0x110   : > { %1329 = vst.msk [vmem:[%s2016_s18 + $0x8] sm:$0xf] %vm1326_vm3, %v1633_v50  ;;  %1361 = vst.msk [vmem:[%s2016_s18 + $0x88] sm:$0xf] %vm1326_vm3, %v1665_v51  ;;  %v1634_v54 = vpack.c.bf16 %v1009_v52, %v1009_v52  ;;  %v1666_v55 = vpack.c.bf16 %v1041_v53, %v1041_v53 }
 0x111   : > { %v767_v56 = vpop.f32.mrb[8].mxu0  ;;  %v895_v57 = vpop.f32.mrb[8].mxu1 }
 0x112   : > { %1330 = vst.msk [vmem:[%s2016_s18 + $0xc] sm:$0xf] %vm1326_vm3, %v1634_v54  ;;  %1362 = vst.msk [vmem:[%s2016_s18 + $0x8c] sm:$0xf] %vm1326_vm3, %v1666_v55  ;;  %v768_v58 = vadd.f32 %v2006_v15, %v767_v56  ;;  %v896_v59 = vadd.f32 %v2006_v15, %v895_v57  ;;  %v769_v60 = vpop.f32.mrb[9].mxu0  ;;  %v897_v61 = vpop.f32.mrb[9].mxu1 }
 0x113   : > { %v770_v62 = vpop.f32.mrb[10].mxu0  ;;  %v898_v63 = vpop.f32.mrb[10].mxu1 }
 0x114   : > { %v1010_v0 = vmax.f32 %v768_v58, 0.0  ;;  %v1042_v1 = vmax.f32 %v896_v59, 0.0  ;;  %v771_v2 = vadd.f32 %v2006_v15, %v770_v62  ;;  %v899_v3 = vadd.f32 %v2006_v15, %v898_v63  ;;  %v772_v4 = vpop.f32.mrb[11].mxu0  ;;  %v900_v5 = vpop.f32.mrb[11].mxu1 }
 0x116   : > { %v1635_v6 = vpack.c.bf16 %v1010_v0, %v1010_v0  ;;  %v1667_v7 = vpack.c.bf16 %v1042_v1, %v1042_v1  ;;  %v1011_v8 = vmax.f32 %v771_v2, 0.0  ;;  %v1043_v9 = vmax.f32 %v899_v3, 0.0 }
 0x118   : > { %1331 = vst.msk [vmem:[%s2016_s18 + $0x10] sm:$0xf] %vm1326_vm3, %v1635_v6  ;;  %1363 = vst.msk [vmem:[%s2016_s18 + $0x90] sm:$0xf] %vm1326_vm3, %v1667_v7  ;;  %v1636_v10 = vpack.c.bf16 %v1011_v8, %v1011_v8  ;;  %v1668_v11 = vpack.c.bf16 %v1043_v9, %v1043_v9 }
 0x119   : > { %v775_v12 = vpop.f32.mrb[12].mxu0  ;;  %v903_v13 = vpop.f32.mrb[12].mxu1 }
 0x11a   : > { %1332 = vst.msk [vmem:[%s2016_s18 + $0x14] sm:$0xf] %vm1326_vm3, %v1636_v10  ;;  %1364 = vst.msk [vmem:[%s2016_s18 + $0x94] sm:$0xf] %vm1326_vm3, %v1668_v11  ;;  %v776_v14 = vadd.f32 %v2006_v15, %v775_v12  ;;  %v904_v16 = vadd.f32 %v2006_v15, %v903_v13  ;;  %v777_v17 = vpop.f32.mrb[13].mxu0  ;;  %v905_v18 = vpop.f32.mrb[13].mxu1 }
 0x11b   : > { %v778_v19 = vpop.f32.mrb[14].mxu0  ;;  %v906_v20 = vpop.f32.mrb[14].mxu1 }
 0x11c   : > { %v1012_v21 = vmax.f32 %v776_v14, 0.0  ;;  %v1044_v22 = vmax.f32 %v904_v16, 0.0  ;;  %v779_v23 = vadd.f32 %v2006_v15, %v778_v19  ;;  %v907_v24 = vadd.f32 %v2006_v15, %v906_v20  ;;  %v780_v25 = vpop.f32.mrb[15].mxu0  ;;  %v908_v26 = vpop.f32.mrb[15].mxu1 }
 0x11e   : > { %v1637_v27 = vpack.c.bf16 %v1012_v21, %v1012_v21  ;;  %v1669_v28 = vpack.c.bf16 %v1044_v22, %v1044_v22  ;;  %v1013_v29 = vmax.f32 %v779_v23, 0.0  ;;  %v1045_v30 = vmax.f32 %v907_v24, 0.0 }
 0x120   : > { %1333 = vst.msk [vmem:[%s2016_s18 + $0x18] sm:$0xf] %vm1326_vm3, %v1637_v27  ;;  %1365 = vst.msk [vmem:[%s2016_s18 + $0x98] sm:$0xf] %vm1326_vm3, %v1669_v28  ;;  %v1638_v31 = vpack.c.bf16 %v1013_v29, %v1013_v29  ;;  %v1670_v32 = vpack.c.bf16 %v1045_v30, %v1045_v30 }
 0x121   : > { %v783_v33 = vpop.f32.mrb[16].mxu0  ;;  %v911_v34 = vpop.f32.mrb[16].mxu1 }
 0x122   : > { %1334 = vst.msk [vmem:[%s2016_s18 + $0x1c] sm:$0xf] %vm1326_vm3, %v1638_v31  ;;  %1366 = vst.msk [vmem:[%s2016_s18 + $0x9c] sm:$0xf] %vm1326_vm3, %v1670_v32  ;;  %v784_v35 = vadd.f32 %v2006_v15, %v783_v33  ;;  %v912_v36 = vadd.f32 %v2006_v15, %v911_v34  ;;  %v785_v37 = vpop.f32.mrb[17].mxu0  ;;  %v913_v38 = vpop.f32.mrb[17].mxu1 }
 0x123   : > { %v786_v39 = vpop.f32.mrb[18].mxu0  ;;  %v914_v40 = vpop.f32.mrb[18].mxu1 }
 0x124   : > { %v1014_v41 = vmax.f32 %v784_v35, 0.0  ;;  %v1046_v42 = vmax.f32 %v912_v36, 0.0  ;;  %v787_v43 = vadd.f32 %v2006_v15, %v786_v39  ;;  %v915_v44 = vadd.f32 %v2006_v15, %v914_v40  ;;  %v788_v45 = vpop.f32.mrb[19].mxu0  ;;  %v916_v46 = vpop.f32.mrb[19].mxu1 }
 0x126   : > { %v1639_v47 = vpack.c.bf16 %v1014_v41, %v1014_v41  ;;  %v1671_v48 = vpack.c.bf16 %v1046_v42, %v1046_v42  ;;  %v1015_v49 = vmax.f32 %v787_v43, 0.0  ;;  %v1047_v50 = vmax.f32 %v915_v44, 0.0 }
 0x128   : > { %1335 = vst.msk [vmem:[%s2016_s18 + $0x20] sm:$0xf] %vm1326_vm3, %v1639_v47  ;;  %1367 = vst.msk [vmem:[%s2016_s18 + $0xa0] sm:$0xf] %vm1326_vm3, %v1671_v48  ;;  %v1640_v51 = vpack.c.bf16 %v1015_v49, %v1015_v49  ;;  %v1672_v52 = vpack.c.bf16 %v1047_v50, %v1047_v50 }
 0x129   : > { %v791_v53 = vpop.f32.mrb[20].mxu0  ;;  %v919_v54 = vpop.f32.mrb[20].mxu1 }
 0x12a   : > { %1336 = vst.msk [vmem:[%s2016_s18 + $0x24] sm:$0xf] %vm1326_vm3, %v1640_v51  ;;  %1368 = vst.msk [vmem:[%s2016_s18 + $0xa4] sm:$0xf] %vm1326_vm3, %v1672_v52  ;;  %v792_v55 = vadd.f32 %v2006_v15, %v791_v53  ;;  %v920_v56 = vadd.f32 %v2006_v15, %v919_v54  ;;  %v793_v57 = vpop.f32.mrb[21].mxu0  ;;  %v921_v58 = vpop.f32.mrb[21].mxu1 }
 0x12b   : > { %v794_v59 = vpop.f32.mrb[22].mxu0  ;;  %v922_v60 = vpop.f32.mrb[22].mxu1 }
 0x12c   : > { %v1016_v61 = vmax.f32 %v792_v55, 0.0  ;;  %v1048_v62 = vmax.f32 %v920_v56, 0.0  ;;  %v795_v63 = vadd.f32 %v2006_v15, %v794_v59  ;;  %v923_v0 = vadd.f32 %v2006_v15, %v922_v60  ;;  %v796_v1 = vpop.f32.mrb[23].mxu0  ;;  %v924_v2 = vpop.f32.mrb[23].mxu1 }
 0x12e   : > { %v1641_v3 = vpack.c.bf16 %v1016_v61, %v1016_v61  ;;  %v1673_v4 = vpack.c.bf16 %v1048_v62, %v1048_v62  ;;  %v1017_v5 = vmax.f32 %v795_v63, 0.0  ;;  %v1049_v6 = vmax.f32 %v923_v0, 0.0 }
 0x130   : > { %1337 = vst.msk [vmem:[%s2016_s18 + $0x28] sm:$0xf] %vm1326_vm3, %v1641_v3  ;;  %1369 = vst.msk [vmem:[%s2016_s18 + $0xa8] sm:$0xf] %vm1326_vm3, %v1673_v4  ;;  %v1642_v7 = vpack.c.bf16 %v1017_v5, %v1017_v5  ;;  %v1674_v8 = vpack.c.bf16 %v1049_v6, %v1049_v6 }
 0x131   : > { %v799_v9 = vpop.f32.mrb[24].mxu0  ;;  %v927_v10 = vpop.f32.mrb[24].mxu1 }
 0x132   : > { %1338 = vst.msk [vmem:[%s2016_s18 + $0x2c] sm:$0xf] %vm1326_vm3, %v1642_v7  ;;  %1370 = vst.msk [vmem:[%s2016_s18 + $0xac] sm:$0xf] %vm1326_vm3, %v1674_v8  ;;  %v800_v11 = vadd.f32 %v2006_v15, %v799_v9  ;;  %v928_v12 = vadd.f32 %v2006_v15, %v927_v10  ;;  %v801_v13 = vpop.f32.mrb[25].mxu0  ;;  %v929_v14 = vpop.f32.mrb[25].mxu1 }
 0x133   : > { %v802_v16 = vpop.f32.mrb[26].mxu0  ;;  %v930_v17 = vpop.f32.mrb[26].mxu1 }
 0x134   : > { %v1018_v18 = vmax.f32 %v800_v11, 0.0  ;;  %v1050_v19 = vmax.f32 %v928_v12, 0.0  ;;  %v803_v20 = vadd.f32 %v2006_v15, %v802_v16  ;;  %v931_v21 = vadd.f32 %v2006_v15, %v930_v17  ;;  %v804_v22 = vpop.f32.mrb[27].mxu0  ;;  %v932_v23 = vpop.f32.mrb[27].mxu1 }
 0x136   : > { %v1643_v24 = vpack.c.bf16 %v1018_v18, %v1018_v18  ;;  %v1675_v25 = vpack.c.bf16 %v1050_v19, %v1050_v19  ;;  %v1019_v26 = vmax.f32 %v803_v20, 0.0  ;;  %v1051_v27 = vmax.f32 %v931_v21, 0.0 }
 0x138   : > { %1339 = vst.msk [vmem:[%s2016_s18 + $0x30] sm:$0xf] %vm1326_vm3, %v1643_v24  ;;  %1371 = vst.msk [vmem:[%s2016_s18 + $0xb0] sm:$0xf] %vm1326_vm3, %v1675_v25  ;;  %v1644_v28 = vpack.c.bf16 %v1019_v26, %v1019_v26  ;;  %v1676_v29 = vpack.c.bf16 %v1051_v27, %v1051_v27 }
 0x139   : > { %v807_v30 = vpop.f32.mrb[28].mxu0  ;;  %v935_v31 = vpop.f32.mrb[28].mxu1 }
 0x13a   : > { %1340 = vst.msk [vmem:[%s2016_s18 + $0x34] sm:$0xf] %vm1326_vm3, %v1644_v28  ;;  %1372 = vst.msk [vmem:[%s2016_s18 + $0xb4] sm:$0xf] %vm1326_vm3, %v1676_v29  ;;  %v808_v32 = vadd.f32 %v2006_v15, %v807_v30  ;;  %v936_v33 = vadd.f32 %v2006_v15, %v935_v31  ;;  %v809_v34 = vpop.f32.mrb[29].mxu0  ;;  %v937_v35 = vpop.f32.mrb[29].mxu1 }
 0x13b   : > { %v810_v36 = vpop.f32.mrb[30].mxu0  ;;  %v938_v37 = vpop.f32.mrb[30].mxu1 }
 0x13c   : > { %v1020_v38 = vmax.f32 %v808_v32, 0.0  ;;  %v1052_v39 = vmax.f32 %v936_v33, 0.0  ;;  %v811_v40 = vadd.f32 %v2006_v15, %v810_v36  ;;  %v939_v41 = vadd.f32 %v2006_v15, %v938_v37  ;;  %v812_v42 = vpop.f32.mrb[31].mxu0  ;;  %v940_v43 = vpop.f32.mrb[31].mxu1 }
 0x13e   : > { %v1645_v44 = vpack.c.bf16 %v1020_v38, %v1020_v38  ;;  %v1677_v45 = vpack.c.bf16 %v1052_v39, %v1052_v39  ;;  %v1021_v46 = vmax.f32 %v811_v40, 0.0  ;;  %v1053_v47 = vmax.f32 %v939_v41, 0.0 }
 0x140   : > { %1341 = vst.msk [vmem:[%s2016_s18 + $0x38] sm:$0xf] %vm1326_vm3, %v1645_v44  ;;  %1373 = vst.msk [vmem:[%s2016_s18 + $0xb8] sm:$0xf] %vm1326_vm3, %v1677_v45  ;;  %v1646_v48 = vpack.c.bf16 %v1021_v46, %v1021_v46  ;;  %v1678_v49 = vpack.c.bf16 %v1053_v47, %v1053_v47 }
 0x141   : > { %v815_v50 = vpop.f32.mrb[32].mxu0  ;;  %v943_v51 = vpop.f32.mrb[32].mxu1 }
 0x142   : > { %1342 = vst.msk [vmem:[%s2016_s18 + $0x3c] sm:$0xf] %vm1326_vm3, %v1646_v48  ;;  %1374 = vst.msk [vmem:[%s2016_s18 + $0xbc] sm:$0xf] %vm1326_vm3, %v1678_v49  ;;  %v816_v52 = vadd.f32 %v2006_v15, %v815_v50  ;;  %v944_v53 = vadd.f32 %v2006_v15, %v943_v51  ;;  %v817_v54 = vpop.f32.mrb[33].mxu0  ;;  %v945_v55 = vpop.f32.mrb[33].mxu1 }
 0x143   : > { %v818_v56 = vpop.f32.mrb[34].mxu0  ;;  %v946_v57 = vpop.f32.mrb[34].mxu1 }
 0x144   : > { %v1022_v58 = vmax.f32 %v816_v52, 0.0  ;;  %v1054_v59 = vmax.f32 %v944_v53, 0.0  ;;  %v819_v60 = vadd.f32 %v2006_v15, %v818_v56  ;;  %v947_v61 = vadd.f32 %v2006_v15, %v946_v57  ;;  %v820_v62 = vpop.f32.mrb[35].mxu0  ;;  %v948_v63 = vpop.f32.mrb[35].mxu1 }
 0x146   : > { %v1647_v0 = vpack.c.bf16 %v1022_v58, %v1022_v58  ;;  %v1679_v1 = vpack.c.bf16 %v1054_v59, %v1054_v59  ;;  %v1023_v2 = vmax.f32 %v819_v60, 0.0  ;;  %v1055_v3 = vmax.f32 %v947_v61, 0.0 }
 0x148   : > { %1343 = vst.msk [vmem:[%s2016_s18 + $0x40] sm:$0xf] %vm1326_vm3, %v1647_v0  ;;  %1375 = vst.msk [vmem:[%s2016_s18 + $0xc0] sm:$0xf] %vm1326_vm3, %v1679_v1  ;;  %v1648_v4 = vpack.c.bf16 %v1023_v2, %v1023_v2  ;;  %v1680_v5 = vpack.c.bf16 %v1055_v3, %v1055_v3 }
 0x149   : > { %v823_v6 = vpop.f32.mrb[36].mxu0  ;;  %v951_v7 = vpop.f32.mrb[36].mxu1 }
 0x14a   : > { %1344 = vst.msk [vmem:[%s2016_s18 + $0x44] sm:$0xf] %vm1326_vm3, %v1648_v4  ;;  %1376 = vst.msk [vmem:[%s2016_s18 + $0xc4] sm:$0xf] %vm1326_vm3, %v1680_v5  ;;  %v824_v8 = vadd.f32 %v2006_v15, %v823_v6  ;;  %v952_v9 = vadd.f32 %v2006_v15, %v951_v7  ;;  %v825_v10 = vpop.f32.mrb[37].mxu0  ;;  %v953_v11 = vpop.f32.mrb[37].mxu1 }
 0x14b   : > { %v826_v12 = vpop.f32.mrb[38].mxu0  ;;  %v954_v13 = vpop.f32.mrb[38].mxu1 }
 0x14c   : > { %v1024_v14 = vmax.f32 %v824_v8, 0.0  ;;  %v1056_v16 = vmax.f32 %v952_v9, 0.0  ;;  %v827_v17 = vadd.f32 %v2006_v15, %v826_v12  ;;  %v955_v18 = vadd.f32 %v2006_v15, %v954_v13  ;;  %v828_v19 = vpop.f32.mrb[39].mxu0  ;;  %v956_v20 = vpop.f32.mrb[39].mxu1 }
 0x14e   : > { %v1649_v21 = vpack.c.bf16 %v1024_v14, %v1024_v14  ;;  %v1681_v22 = vpack.c.bf16 %v1056_v16, %v1056_v16  ;;  %v1025_v23 = vmax.f32 %v827_v17, 0.0  ;;  %v1057_v24 = vmax.f32 %v955_v18, 0.0 }
 0x150   : > { %1345 = vst.msk [vmem:[%s2016_s18 + $0x48] sm:$0xf] %vm1326_vm3, %v1649_v21  ;;  %1377 = vst.msk [vmem:[%s2016_s18 + $0xc8] sm:$0xf] %vm1326_vm3, %v1681_v22  ;;  %v1650_v25 = vpack.c.bf16 %v1025_v23, %v1025_v23  ;;  %v1682_v26 = vpack.c.bf16 %v1057_v24, %v1057_v24 }
 0x151   : > { %v831_v27 = vpop.f32.mrb[40].mxu0  ;;  %v959_v28 = vpop.f32.mrb[40].mxu1 }
 0x152   : > { %1346 = vst.msk [vmem:[%s2016_s18 + $0x4c] sm:$0xf] %vm1326_vm3, %v1650_v25  ;;  %1378 = vst.msk [vmem:[%s2016_s18 + $0xcc] sm:$0xf] %vm1326_vm3, %v1682_v26  ;;  %v832_v29 = vadd.f32 %v2006_v15, %v831_v27  ;;  %v960_v30 = vadd.f32 %v2006_v15, %v959_v28  ;;  %v833_v31 = vpop.f32.mrb[41].mxu0  ;;  %v961_v32 = vpop.f32.mrb[41].mxu1 }
 0x153   : > { %v834_v33 = vpop.f32.mrb[42].mxu0  ;;  %v962_v34 = vpop.f32.mrb[42].mxu1 }
 0x154   : > { %v1026_v35 = vmax.f32 %v832_v29, 0.0  ;;  %v1058_v36 = vmax.f32 %v960_v30, 0.0  ;;  %v835_v37 = vadd.f32 %v2006_v15, %v834_v33  ;;  %v963_v38 = vadd.f32 %v2006_v15, %v962_v34  ;;  %v836_v39 = vpop.f32.mrb[43].mxu0  ;;  %v964_v40 = vpop.f32.mrb[43].mxu1 }
 0x156   : > { %v1651_v41 = vpack.c.bf16 %v1026_v35, %v1026_v35  ;;  %v1683_v42 = vpack.c.bf16 %v1058_v36, %v1058_v36  ;;  %v1027_v43 = vmax.f32 %v835_v37, 0.0  ;;  %v1059_v44 = vmax.f32 %v963_v38, 0.0 }
 0x158   : > { %1347 = vst.msk [vmem:[%s2016_s18 + $0x50] sm:$0xf] %vm1326_vm3, %v1651_v41  ;;  %1379 = vst.msk [vmem:[%s2016_s18 + $0xd0] sm:$0xf] %vm1326_vm3, %v1683_v42  ;;  %v1652_v45 = vpack.c.bf16 %v1027_v43, %v1027_v43  ;;  %v1684_v46 = vpack.c.bf16 %v1059_v44, %v1059_v44 }
 0x159   : > { %v839_v47 = vpop.f32.mrb[44].mxu0  ;;  %v967_v48 = vpop.f32.mrb[44].mxu1 }
 0x15a   : > { %1348 = vst.msk [vmem:[%s2016_s18 + $0x54] sm:$0xf] %vm1326_vm3, %v1652_v45  ;;  %1380 = vst.msk [vmem:[%s2016_s18 + $0xd4] sm:$0xf] %vm1326_vm3, %v1684_v46  ;;  %v840_v49 = vadd.f32 %v2006_v15, %v839_v47  ;;  %v968_v50 = vadd.f32 %v2006_v15, %v967_v48  ;;  %v841_v51 = vpop.f32.mrb[45].mxu0  ;;  %v969_v52 = vpop.f32.mrb[45].mxu1 }
 0x15b   : > { %v842_v53 = vpop.f32.mrb[46].mxu0  ;;  %v970_v54 = vpop.f32.mrb[46].mxu1 }
 0x15c   : > { %v1028_v55 = vmax.f32 %v840_v49, 0.0  ;;  %v1060_v56 = vmax.f32 %v968_v50, 0.0  ;;  %v843_v57 = vadd.f32 %v2006_v15, %v842_v53  ;;  %v971_v58 = vadd.f32 %v2006_v15, %v970_v54  ;;  %v844_v59 = vpop.f32.mrb[47].mxu0  ;;  %v972_v60 = vpop.f32.mrb[47].mxu1 }
 0x15e   : > { %v1653_v61 = vpack.c.bf16 %v1028_v55, %v1028_v55  ;;  %v1685_v62 = vpack.c.bf16 %v1060_v56, %v1060_v56  ;;  %v1029_v63 = vmax.f32 %v843_v57, 0.0  ;;  %v1061_v0 = vmax.f32 %v971_v58, 0.0 }
 0x160   : > { %1349 = vst.msk [vmem:[%s2016_s18 + $0x58] sm:$0xf] %vm1326_vm3, %v1653_v61  ;;  %1381 = vst.msk [vmem:[%s2016_s18 + $0xd8] sm:$0xf] %vm1326_vm3, %v1685_v62  ;;  %v1654_v1 = vpack.c.bf16 %v1029_v63, %v1029_v63  ;;  %v1686_v2 = vpack.c.bf16 %v1061_v0, %v1061_v0 }
 0x161   : > { %v847_v3 = vpop.f32.mrb[48].mxu0  ;;  %v975_v4 = vpop.f32.mrb[48].mxu1 }
 0x162   : > { %1350 = vst.msk [vmem:[%s2016_s18 + $0x5c] sm:$0xf] %vm1326_vm3, %v1654_v1  ;;  %1382 = vst.msk [vmem:[%s2016_s18 + $0xdc] sm:$0xf] %vm1326_vm3, %v1686_v2  ;;  %v848_v5 = vadd.f32 %v2006_v15, %v847_v3  ;;  %v976_v6 = vadd.f32 %v2006_v15, %v975_v4  ;;  %v849_v7 = vpop.f32.mrb[49].mxu0  ;;  %v977_v8 = vpop.f32.mrb[49].mxu1 }
 0x163   : > { %v850_v9 = vpop.f32.mrb[50].mxu0  ;;  %v978_v10 = vpop.f32.mrb[50].mxu1 }
 0x164   : > { %v1030_v11 = vmax.f32 %v848_v5, 0.0  ;;  %v1062_v12 = vmax.f32 %v976_v6, 0.0  ;;  %v851_v13 = vadd.f32 %v2006_v15, %v850_v9  ;;  %v979_v14 = vadd.f32 %v2006_v15, %v978_v10  ;;  %v852_v16 = vpop.f32.mrb[51].mxu0  ;;  %v980_v17 = vpop.f32.mrb[51].mxu1 }
 0x166   : > { %v1655_v18 = vpack.c.bf16 %v1030_v11, %v1030_v11  ;;  %v1687_v19 = vpack.c.bf16 %v1062_v12, %v1062_v12  ;;  %v1031_v20 = vmax.f32 %v851_v13, 0.0  ;;  %v1063_v21 = vmax.f32 %v979_v14, 0.0 }
 0x168   : > { %1351 = vst.msk [vmem:[%s2016_s18 + $0x60] sm:$0xf] %vm1326_vm3, %v1655_v18  ;;  %1383 = vst.msk [vmem:[%s2016_s18 + $0xe0] sm:$0xf] %vm1326_vm3, %v1687_v19  ;;  %v1656_v22 = vpack.c.bf16 %v1031_v20, %v1031_v20  ;;  %v1688_v23 = vpack.c.bf16 %v1063_v21, %v1063_v21 }
 0x169   : > { %v855_v24 = vpop.f32.mrb[52].mxu0  ;;  %v983_v25 = vpop.f32.mrb[52].mxu1 }
 0x16a   : > { %1352 = vst.msk [vmem:[%s2016_s18 + $0x64] sm:$0xf] %vm1326_vm3, %v1656_v22  ;;  %1384 = vst.msk [vmem:[%s2016_s18 + $0xe4] sm:$0xf] %vm1326_vm3, %v1688_v23  ;;  %v856_v26 = vadd.f32 %v2006_v15, %v855_v24  ;;  %v984_v27 = vadd.f32 %v2006_v15, %v983_v25  ;;  %v857_v28 = vpop.f32.mrb[53].mxu0  ;;  %v985_v29 = vpop.f32.mrb[53].mxu1 }
 0x16b   : > { %v858_v30 = vpop.f32.mrb[54].mxu0  ;;  %v986_v31 = vpop.f32.mrb[54].mxu1 }
 0x16c   : > { %v1032_v32 = vmax.f32 %v856_v26, 0.0  ;;  %v1064_v33 = vmax.f32 %v984_v27, 0.0  ;;  %v859_v34 = vadd.f32 %v2006_v15, %v858_v30  ;;  %v987_v35 = vadd.f32 %v2006_v15, %v986_v31  ;;  %v860_v36 = vpop.f32.mrb[55].mxu0  ;;  %v988_v37 = vpop.f32.mrb[55].mxu1 }
 0x16e   : > { %v1657_v38 = vpack.c.bf16 %v1032_v32, %v1032_v32  ;;  %v1689_v39 = vpack.c.bf16 %v1064_v33, %v1064_v33  ;;  %v1033_v40 = vmax.f32 %v859_v34, 0.0  ;;  %v1065_v41 = vmax.f32 %v987_v35, 0.0 }
 0x170   : > { %1353 = vst.msk [vmem:[%s2016_s18 + $0x68] sm:$0xf] %vm1326_vm3, %v1657_v38  ;;  %1385 = vst.msk [vmem:[%s2016_s18 + $0xe8] sm:$0xf] %vm1326_vm3, %v1689_v39  ;;  %v1658_v42 = vpack.c.bf16 %v1033_v40, %v1033_v40  ;;  %v1690_v43 = vpack.c.bf16 %v1065_v41, %v1065_v41 }
 0x171   : > { %v863_v44 = vpop.f32.mrb[56].mxu0  ;;  %v991_v45 = vpop.f32.mrb[56].mxu1 }
 0x172   : > { %1354 = vst.msk [vmem:[%s2016_s18 + $0x6c] sm:$0xf] %vm1326_vm3, %v1658_v42  ;;  %1386 = vst.msk [vmem:[%s2016_s18 + $0xec] sm:$0xf] %vm1326_vm3, %v1690_v43  ;;  %v864_v46 = vadd.f32 %v2006_v15, %v863_v44  ;;  %v992_v47 = vadd.f32 %v2006_v15, %v991_v45  ;;  %v865_v48 = vpop.f32.mrb[57].mxu0  ;;  %v993_v49 = vpop.f32.mrb[57].mxu1 }
 0x173   : > { %v866_v50 = vpop.f32.mrb[58].mxu0  ;;  %v994_v51 = vpop.f32.mrb[58].mxu1 }
 0x174   : > { %v1034_v52 = vmax.f32 %v864_v46, 0.0  ;;  %v1066_v53 = vmax.f32 %v992_v47, 0.0  ;;  %v867_v54 = vadd.f32 %v2006_v15, %v866_v50  ;;  %v995_v55 = vadd.f32 %v2006_v15, %v994_v51  ;;  %v868_v56 = vpop.f32.mrb[59].mxu0  ;;  %v996_v57 = vpop.f32.mrb[59].mxu1 }
 0x176   : > { %v1659_v58 = vpack.c.bf16 %v1034_v52, %v1034_v52  ;;  %v1691_v59 = vpack.c.bf16 %v1066_v53, %v1066_v53  ;;  %v1035_v60 = vmax.f32 %v867_v54, 0.0  ;;  %v1067_v61 = vmax.f32 %v995_v55, 0.0 }
 0x178   : > { %1355 = vst.msk [vmem:[%s2016_s18 + $0x70] sm:$0xf] %vm1326_vm3, %v1659_v58  ;;  %1387 = vst.msk [vmem:[%s2016_s18 + $0xf0] sm:$0xf] %vm1326_vm3, %v1691_v59  ;;  %v1660_v62 = vpack.c.bf16 %v1035_v60, %v1035_v60  ;;  %v1692_v63 = vpack.c.bf16 %v1067_v61, %v1067_v61 }
 0x179   : > { %v871_v0 = vpop.f32.mrb[60].mxu0  ;;  %v999_v1 = vpop.f32.mrb[60].mxu1 }
 0x17a   : > { %1356 = vst.msk [vmem:[%s2016_s18 + $0x74] sm:$0xf] %vm1326_vm3, %v1660_v62  ;;  %1388 = vst.msk [vmem:[%s2016_s18 + $0xf4] sm:$0xf] %vm1326_vm3, %v1692_v63  ;;  %v872_v2 = vadd.f32 %v2006_v15, %v871_v0  ;;  %v1000_v3 = vadd.f32 %v2006_v15, %v999_v1  ;;  %v873_v4 = vpop.f32.mrb[61].mxu0  ;;  %v1001_v5 = vpop.f32.mrb[61].mxu1 }
 0x17b   : > { %v874_v6 = vpop.f32.mrb[62].mxu0  ;;  %v1002_v7 = vpop.f32.mrb[62].mxu1 }
 0x17c   : > { %v1036_v8 = vmax.f32 %v872_v2, 0.0  ;;  %v1068_v9 = vmax.f32 %v1000_v3, 0.0  ;;  %v875_v10 = vadd.f32 %v2006_v15, %v874_v6  ;;  %v1003_v11 = vadd.f32 %v2006_v15, %v1002_v7  ;;  %v876_v12 = vpop.f32.mrb[63].mxu0  ;;  %v1004_v13 = vpop.f32.mrb[63].mxu1 }
 0x17e   : > { %v1661_v14 = vpack.c.bf16 %v1036_v8, %v1036_v8  ;;  %v1693_v16 = vpack.c.bf16 %v1068_v9, %v1068_v9  ;;  %v1037_v17 = vmax.f32 %v875_v10, 0.0  ;;  %v1069_v18 = vmax.f32 %v1003_v11, 0.0 }
 0x180   : > { %1357 = vst.msk [vmem:[%s2016_s18 + $0x78] sm:$0xf] %vm1326_vm3, %v1661_v14  ;;  %1389 = vst.msk [vmem:[%s2016_s18 + $0xf8] sm:$0xf] %vm1326_vm3, %v1693_v16  ;;  %v1662_v19 = vpack.c.bf16 %v1037_v17, %v1037_v17  ;;  %v1694_v20 = vpack.c.bf16 %v1069_v18, %v1069_v18 }
 0x182   : > { %1358 = vst.msk [vmem:[%s2016_s18 + $0x7c] sm:$0xf] %vm1326_vm3, %v1662_v19  ;;  %1390 = vst.msk [vmem:[%s2016_s18 + $0xfc] sm:$0xf] %vm1326_vm3, %v1694_v20 }
 0x183 PF: > { %s13_s12 = sadd.s32 1, %s1837_s12  }
 0x184   : > { %p10_p4 = scmp.ge.s32.totalorder %s13_s12, 6  }
 0x186   :  { %12 = sbr.rel (!%p10_p4) target bundleno = 1 (0x1), region = 62 }

// kernel: feature_loss.3
= control target key start
LH: loop header
LB: loop body
LE: loop exit
PB: predicated region body
PF: predicated region fallthrough
CT: control target
= control target key end

     0   :  { %7 = vsyncpa [#allocation8], 0  ;;  %s1397_s9 = smov 0   ;;  %s1399_s10 = smov 0   ;;  %s1783_s0 = inlined_call_operand.vmem [shape: bf16[2,256,64], index: 0, kind: input, shape index: {}]   ;;  %s1784_s1 = inlined_call_operand.vmem [shape: f32[2,4,256], index: 1, kind: input, shape index: {}]   ;;  %s1785_s2 = inlined_call_operand.hbm [shape: f32[1,1], index: 2, kind: output, shape index: {}]  }
   0x1   :  { %s1401_s11 = smov 0  }
   0x2 LB: > { %s1413_s12 = sadd.s32 4294967295, %s1375_s11   ;;  %s1416_s13 = sadd.s32 1, %s1375_s11   ;;  %s1375_s11 = sphi %s1401_s11, %s1789_s11   ;;  %s1371_s10 = sphi %s1399_s10, %s1788_s10   ;;  %s1367_s9 = sphi %s1397_s9, %s1787_s9  }
   0x3   : > { %s17_s14 = ssub.s32 %s1375_s11, %s1416_s13  ;;  %s20_s15 = sadd.s32 1, %s1371_s10 }
   0x4   : > { %p18_p0 = scmp.eq.s32.totalorder %s17_s14, 0  ;;  %p27_p1 = scmp.ne.s32.totalorder %s1371_s10, %s1367_s9 }
   0x5   : > { %p28_p2 = scmp.eq.s32.totalorder %s1375_s11, 0  ;;  %p1172_p4 = scmp.ge.s32.totalorder %s1375_s11, 2 }
   0x6   : > { %s1425_s16 = scalar_select %p18_p0, %s1371_s10, %s20_s15  }
   0x7   : > { %p1427_p3 = por %p28_p2, %p27_p1  ;;  %100 = sbr.rel (%p1172_p4) target bundleno = 33 (0x21), region = 16 }
   0xe   : > { %103 = sbr.rel (!%p1427_p3) target bundleno = 26 (0x1a), region = 20  ;;  %s105_s18 = sand.u32 (%p1427_p3), 1, %s1371_s10  }
   0xf   : > { %s1203_s19 = sshll.u32 (%p1427_p3), %s1375_s11, 6  ;;  %s1173_s20 = sshll.u32 (%p1427_p3), %s105_s18, 7 }
  0x10   : > { %s1439_s23 = scalar_lea.vmem (%p1427_p3), %s1783_s0, %s1203_s19  ;;  %s107_s24 = scalar_lea.vmem (%p1427_p3), [#allocation5], %s1173_s20 }
  0x11   : > { %v126_v0 = vld [vmem:[%s1439_s23] sm:$0xff] (%p1427_p3)   ;;  %v130_v1 = vld [vmem:[%s1439_s23 + $0x8] sm:$0xff] (%p1427_p3)   ;;  %v134_v2 = vld [vmem:[%s1439_s23 + $0x10] sm:$0xff] (%p1427_p3)  }
  0x12   : > { %127 = vst [vmem:[%s107_s24] sm:$0xff] (%p1427_p3), %v126_v0   ;;  %131 = vst [vmem:[%s107_s24 + $0x8] sm:$0xff] (%p1427_p3), %v130_v1   ;;  %v138_v3 = vld [vmem:[%s1439_s23 + $0x18] sm:$0xff] (%p1427_p3)   ;;  %v142_v4 = vld [vmem:[%s1439_s23 + $0x20] sm:$0xff] (%p1427_p3)  }
  0x13   : > { %135 = vst [vmem:[%s107_s24 + $0x10] sm:$0xff] (%p1427_p3), %v134_v2   ;;  %v146_v5 = vld [vmem:[%s1439_s23 + $0x28] sm:$0xff] (%p1427_p3)   ;;  %139 = vst [vmem:[%s107_s24 + $0x18] sm:$0xff] (%p1427_p3), %v138_v3   ;;  %v150_v6 = vld [vmem:[%s1439_s23 + $0x30] sm:$0xff] (%p1427_p3)  }
  0x14   : > { %143 = vst [vmem:[%s107_s24 + $0x20] sm:$0xff] (%p1427_p3), %v142_v4   ;;  %147 = vst [vmem:[%s107_s24 + $0x28] sm:$0xff] (%p1427_p3), %v146_v5   ;;  %v154_v7 = vld [vmem:[%s1439_s23 + $0x38] sm:$0xff] (%p1427_p3)   ;;  %v158_v8 = vld [vmem:[%s1439_s23 + $0x80] sm:$0xff] (%p1427_p3)  }
  0x15   : > { %151 = vst [vmem:[%s107_s24 + $0x30] sm:$0xff] %v150_v6   ;;  %155 = vst [vmem:[%s107_s24 + $0x38] sm:$0xff] %v154_v7   ;;  %v162_v9 = vld [vmem:[%s1439_s23 + $0x88] sm:$0xff]   ;;  %v166_v10 = vld [vmem:[%s1439_s23 + $0x90] sm:$0xff]  }
  0x16   : > { %159 = vst [vmem:[%s107_s24 + $0x40] sm:$0xff] %v158_v8   ;;  %v170_v11 = vld [vmem:[%s1439_s23 + $0x98] sm:$0xff]   ;;  %163 = vst [vmem:[%s107_s24 + $0x48] sm:$0xff] %v162_v9   ;;  %v174_v12 = vld [vmem:[%s1439_s23 + $0xa0] sm:$0xff]  }
  0x17   : > { %167 = vst [vmem:[%s107_s24 + $0x50] sm:$0xff] %v166_v10   ;;  %171 = vst [vmem:[%s107_s24 + $0x58] sm:$0xff] %v170_v11   ;;  %v178_v13 = vld [vmem:[%s1439_s23 + $0xa8] sm:$0xff]   ;;  %v182_v14 = vld [vmem:[%s1439_s23 + $0xb0] sm:$0xff]  }
  0x18   : > { %175 = vst [vmem:[%s107_s24 + $0x60] sm:$0xff] %v174_v12   ;;  %179 = vst [vmem:[%s107_s24 + $0x68] sm:$0xff] %v178_v13   ;;  %v186_v15 = vld [vmem:[%s1439_s23 + $0xb8] sm:$0xff]  }
  0x19   : > { %183 = vst [vmem:[%s107_s24 + $0x70] sm:$0xff] %v182_v14   ;;  %187 = vst [vmem:[%s107_s24 + $0x78] sm:$0xff] %v186_v15  }
  0x1a PF: > { %276 = sbr.rel (!%p1427_p3) target bundleno = 33 (0x21), region = 61  ;;  %s278_s25 = sand.u32 (%p1427_p3), 1, %s1371_s10  }
  0x1b   : > { %s1177_s26 = sshll.u32 (%p1427_p3), %s1375_s11, 2  ;;  %s1176_s27 = sshll.u32 (%p1427_p3), %s278_s25, 3 }
  0x1c   : > { %s282_s30 = scalar_lea.vmem (%p1427_p3), %s1784_s1, %s1177_s26  ;;  %s280_s3 = scalar_lea.vmem (%p1427_p3), [#allocation6], %s1176_s27 }
  0x1d   : > { %v298_v16 = vld [vmem:[%s282_s30] sm:$0xf] (%p1427_p3)  ;;  %v300_v17 = vld [vmem:[%s282_s30 + $0x8] sm:$0xf] (%p1427_p3) }
  0x1e   : > { %299 = vst [vmem:[%s280_s3] sm:$0xf] (%p1427_p3), %v298_v16  ;;  %301 = vst [vmem:[%s280_s3 + $0x4] sm:$0xf] (%p1427_p3), %v300_v17 }
  0x21 PF: > { %p1178_p5 = scmp.ge.s32.totalorder %s1375_s11, 1  ;;  %p327_p6 = scmp.lt.s32.totalorder %s1375_s11, 3 }
  0x23   : > { %p328_p7 = pnand %p1178_p5, %p327_p6 }
  0x24   : > { %s334_s4 = sand.u32 (!%p328_p7), 1, %s1367_s9   ;;  %p1181_p8 = scmp.ne.s32.totalorder (!%p328_p7), %s1413_s12, 0 }
  0x25   : > { %331 = sbr.rel (%p328_p7) target bundleno = 814 (0x32e), region = 102  ;;  %s1179_s5 = sshll.u32 (!%p328_p7), %s334_s4, 7 }
  0x26   : > { %s1467_s6 = sshll.u32 (!%p328_p7), %s334_s4, 3  ;;  %s1469_s7 = scalar_lea.vmem (!%p328_p7), [#allocation5], %s1179_s5 }
  0x27   : > { %s343_s8 = scalar_lea.vmem (!%p328_p7), [#allocation6], %s1467_s6 }
  0x2c   : > { %366 = sbr.rel (%p1181_p8) target bundleno = 51 (0x33), region = 114  ;;  %vm367_vm0 = vcmask (!%p1181_p8), 25600   ;;  %vm369_vm1 = vcmask (!%p1181_p8), 519168   ;;  %v1377_v18 = vmov (!%p1181_p8), 0.0  }
  0x2d   : > { %368 = vst.msk [vmem:[#allocation2] sm:$0x3] (!%p1181_p8), %vm367_vm0, %v1377_v18  ;;  %372 = vst.msk [vmem:[#allocation4] sm:$0x3] (!%p1181_p8), %vm367_vm0, %v1377_v18 }
  0x2e   : > { %370 = vst.msk [vmem:[#allocation3] sm:$0xf] (!%p1181_p8), %vm369_vm1, %v1377_v18  ;;  %371 = vst.msk [vmem:[#allocation3 + $0x4] sm:$0xf] (!%p1181_p8), %vm369_vm1, %v1377_v18 }
  0x33 PF: > { %v1474_v19 = vld [vmem:[%s1469_s7 + $0x40] sm:$0xff]   ;;  %v1480_v21 = vld [vmem:[%s1469_s7 + $0x48] sm:$0xff]   ;;  %v1378_v27 = vmov 0.0   ;;  %vm473_vm2 = vcmask 523264   ;;  %vm1379_vm3 = vmmov 0   ;;  %v1502_v42 = vld [vmem:[%s1469_s7 + $0x50] sm:$0xff]  }
  0x34   : > { %v1477_v20 = vld [vmem:[%s1469_s7] sm:$0xff]   ;;  %v421_v22 = vunpack.c.l.bf16 %v1474_v19  ;;  %v422_v24 = vunpack.c.h.bf16 %v1474_v19  ;;  %v1487_v26 = vld [vmem:[%s1469_s7 + $0x8] sm:$0xff]   ;;  %1222 = vmatprep.subr.bf16.mxu0 %v1378_v27  ;;  %1242 = vmatprep.subr.bf16.mxu1 %v1378_v27  ;;  %v423_v28 = vunpack.c.l.bf16 %v1480_v21  ;;  %v424_v36 = vunpack.c.h.bf16 %v1480_v21  ;;  %v377_v43 = vld [vmem:[%s1469_s7 + $0x10] sm:$0xff]   ;;  %p1198_p9 = scmp.ne.s32.totalorder %s1413_s12, 1 }
  0x35   : > { %v405_v23 = vunpack.c.l.bf16 %v1477_v20  ;;  %v406_v25 = vunpack.c.h.bf16 %v1477_v20  ;;  %v407_v29 = vunpack.c.l.bf16 %v1487_v26  ;;  %1238 = vmatprep.mubr.msk.bf16.mxu0 %vm1379_vm3, %v1378_v27  ;;  %1258 = vmatprep.mubr.msk.bf16.mxu1 %vm1379_vm3, %v1378_v27  ;;  %v408_v37 = vunpack.c.h.bf16 %v1487_v26  ;;  %v1512_v56 = vld [vmem:[%s1469_s7 + $0x58] sm:$0xff]   ;;  %v397_v6 = vld [vmem:[%s1469_s7 + $0x60] sm:$0xff]  }
  0x36   : > { %v457_v30 = vmul.f32 %v421_v22, %v421_v22  ;;  %v458_v32 = vmul.f32 %v422_v24, %v422_v24  ;;  %v459_v40 = vmul.f32 %v423_v28, %v423_v28  ;;  %v460_v44 = vmul.f32 %v424_v36, %v424_v36  ;;  %v379_v57 = vld [vmem:[%s1469_s7 + $0x18] sm:$0xff]   ;;  %v381_v7 = vld [vmem:[%s1469_s7 + $0x20] sm:$0xff]   ;;  %1223 = vmatpush3.bf16.msra.mxu0 %v1477_v20  ;;  %v399_v22 = vld [vmem:[%s1469_s7 + $0x68] sm:$0xff]  }
  0x37   : > { %v441_v31 = vmul.f32 %v405_v23, %v405_v23  ;;  %v442_v33 = vmul.f32 %v406_v25, %v406_v25  ;;  %v443_v41 = vmul.f32 %v407_v29, %v407_v29  ;;  %v444_v45 = vmul.f32 %v408_v37, %v408_v37  ;;  %1243 = vmatpush3.bf16.msra.mxu1 %v1474_v19  ;;  %v383_v23 = vld [vmem:[%s1469_s7 + $0x28] sm:$0xff]   ;;  %v385_v36 = vld [vmem:[%s1469_s7 + $0x30] sm:$0xff]  }
  0x38   : > { %v522_v34 = vsel %vm473_vm2, %v457_v30, 0.0  ;;  %v525_v38 = vsel %vm473_vm2, %v458_v32, 0.0  ;;  %v528_v46 = vsel %vm473_vm2, %v459_v40, 0.0  ;;  %v425_v48 = vunpack.c.l.bf16 %v1502_v42  ;;  %1224 = vmatprep.subr.bf16.mxu0 %v1378_v27  ;;  %1244 = vmatprep.subr.bf16.mxu1 %v1378_v27 }
  0x39   : > { %v474_v35 = vsel %vm473_vm2, %v441_v31, 0.0  ;;  %523 = vadd.xlane.f32.xlu1 %v522_v34  ;;  %v477_v39 = vsel %vm473_vm2, %v442_v33, 0.0  ;;  %v480_v47 = vsel %vm473_vm2, %v443_v41, 0.0  ;;  %v409_v49 = vunpack.c.l.bf16 %v377_v43 }
  0x3a   : > { %475 = vadd.xlane.f32.xlu0 %v474_v35  ;;  %v531_v50 = vsel %vm473_vm2, %v460_v44, 0.0  ;;  %v483_v51 = vsel %vm473_vm2, %v444_v45, 0.0  ;;  %v461_v52 = vmul.f32 %v425_v48, %v425_v48  ;;  %v426_v54 = vunpack.c.h.bf16 %v1502_v42  ;;  %1225 = vmatpush3.bf16.msra.mxu0 %v1487_v26  ;;  %v401_v35 = vld [vmem:[%s1469_s7 + $0x70] sm:$0xff]  }
  0x3b   : > { %v445_v53 = vmul.f32 %v409_v49, %v409_v49  ;;  %v410_v55 = vunpack.c.h.bf16 %v377_v43  ;;  %v427_v58 = vunpack.c.l.bf16 %v1512_v56  ;;  %v411_v59 = vunpack.c.l.bf16 %v379_v57  ;;  %1245 = vmatpush3.bf16.msra.mxu1 %v1480_v21  ;;  %1226 = vmatprep.subr.bf16.mxu0 %v1378_v27  ;;  %v403_v49 = vld [vmem:[%s1469_s7 + $0x78] sm:$0xff]  }
  0x3c   : > { %v534_v60 = vsel %vm473_vm2, %v461_v52, 0.0  ;;  %v462_v62 = vmul.f32 %v426_v54, %v426_v54  ;;  %v428_v1 = vunpack.c.h.bf16 %v1512_v56  ;;  %v412_v2 = vunpack.c.h.bf16 %v379_v57  ;;  %1246 = vmatprep.subr.bf16.mxu1 %v1378_v27 }
  0x3d   : > { %526 = vadd.xlane.f32.xlu1 %v525_v38  ;;  %v486_v61 = vsel %vm473_vm2, %v445_v53, 0.0  ;;  %v446_v63 = vmul.f32 %v410_v55, %v410_v55  ;;  %v463_v0 = vmul.f32 %v427_v58, %v427_v58  ;;  %v447_v5 = vmul.f32 %v411_v59, %v411_v59  ;;  %v1571_v59 = vld [vmem:[%s343_s8 + $0x4] sm:$0xf] }
  0x3e   : > { %478 = vadd.xlane.f32.xlu0 %v477_v39  ;;  %v537_v3 = vsel %vm473_vm2, %v462_v62, 0.0  ;;  %v464_v9 = vmul.f32 %v428_v1, %v428_v1  ;;  %v429_v10 = vunpack.c.l.bf16 %v397_v6  ;;  %v448_v12 = vmul.f32 %v412_v2, %v412_v2  ;;  %1227 = vmatpush3.bf16.msra.mxu0 %v377_v43 }
  0x3f   : > { %v489_v4 = vsel %vm473_vm2, %v446_v63, 0.0  ;;  %v540_v8 = vsel %vm473_vm2, %v463_v0, 0.0  ;;  %v492_v11 = vsel %vm473_vm2, %v447_v5, 0.0  ;;  %v413_v13 = vunpack.c.l.bf16 %v381_v7  ;;  %1247 = vmatpush3.bf16.msra.mxu1 %v1502_v42  ;;  %1228 = vmatprep.subr.bf16.mxu0 %v1378_v27 }
  0x40   : > { %v543_v14 = vsel %vm473_vm2, %v464_v9, 0.0  ;;  %v465_v15 = vmul.f32 %v429_v10, %v429_v10  ;;  %v430_v16 = vunpack.c.h.bf16 %v397_v6  ;;  %v495_v17 = vsel %vm473_vm2, %v448_v12, 0.0  ;;  %1248 = vmatprep.subr.bf16.mxu1 %v1378_v27 }
  0x41   : > { %529 = vadd.xlane.f32.xlu1 %v528_v46  ;;  %v449_v18 = vmul.f32 %v413_v13, %v413_v13  ;;  %v414_v20 = vunpack.c.h.bf16 %v381_v7  ;;  %v431_v24 = vunpack.c.l.bf16 %v399_v22  ;;  %v415_v25 = vunpack.c.l.bf16 %v383_v23 }
  0x42   : > { %481 = vadd.xlane.f32.xlu0 %v480_v47  ;;  %v546_v19 = vsel %vm473_vm2, %v465_v15, 0.0  ;;  %v466_v28 = vmul.f32 %v430_v16, %v430_v16  ;;  %1229 = vmatpush3.bf16.msra.mxu0 %v379_v57  ;;  %v432_v31 = vunpack.c.h.bf16 %v399_v22  ;;  %v416_v34 = vunpack.c.h.bf16 %v383_v23 }
  0x43   : > { %v498_v26 = vsel %vm473_vm2, %v449_v18, 0.0  ;;  %v450_v29 = vmul.f32 %v414_v20, %v414_v20  ;;  %v467_v21 = vmul.f32 %v431_v24, %v431_v24  ;;  %v451_v30 = vmul.f32 %v415_v25, %v415_v25  ;;  %1249 = vmatpush3.bf16.msra.mxu1 %v1512_v56  ;;  %1230 = vmatprep.subr.bf16.mxu0 %v1378_v27 }
  0x44   : > { %v549_v32 = vsel %vm473_vm2, %v466_v28, 0.0  ;;  %1250 = vmatprep.subr.bf16.mxu1 %v1378_v27  ;;  %v468_v38 = vmul.f32 %v432_v31, %v432_v31  ;;  %v433_v39 = vunpack.c.l.bf16 %v401_v35  ;;  %v452_v41 = vmul.f32 %v416_v34, %v416_v34 }
  0x45   : > { %532 = vadd.xlane.f32.xlu1 %v531_v50  ;;  %v501_v33 = vsel %vm473_vm2, %v450_v29, 0.0  ;;  %v552_v37 = vsel %vm473_vm2, %v467_v21, 0.0  ;;  %v504_v40 = vsel %vm473_vm2, %v451_v30, 0.0  ;;  %v417_v42 = vunpack.c.l.bf16 %v385_v36  ;;  %v387_v50 = vld [vmem:[%s1469_s7 + $0x38] sm:$0xff]  }
  0x46   : > { %484 = vadd.xlane.f32.xlu0 %v483_v51  ;;  %1231 = vmatpush3.bf16.msra.mxu0 %v381_v7  ;;  %v555_v43 = vsel %vm473_vm2, %v468_v38, 0.0  ;;  %v469_v44 = vmul.f32 %v433_v39, %v433_v39  ;;  %v434_v45 = vunpack.c.h.bf16 %v401_v35  ;;  %v507_v46 = vsel %vm473_vm2, %v452_v41, 0.0  ;;  %v1561_v51 = vld [vmem:[%s343_s8] sm:$0xf] }
  0x47   : > { %1251 = vmatpush3.bf16.msra.mxu1 %v397_v6  ;;  %1232 = vmatprep.subr.bf16.mxu0 %v1378_v27  ;;  %v453_v47 = vmul.f32 %v417_v42, %v417_v42  ;;  %v418_v48 = vunpack.c.h.bf16 %v385_v36  ;;  %v435_v53 = vunpack.c.l.bf16 %v403_v49  ;;  %v419_v54 = vunpack.c.l.bf16 %v387_v50 }
  0x48   : > { %1252 = vmatprep.subr.bf16.mxu1 %v1378_v27  ;;  %v558_v52 = vsel %vm473_vm2, %v469_v44, 0.0  ;;  %v470_v56 = vmul.f32 %v434_v45, %v434_v45  ;;  %v439_v58 = vpack.c.bf16 %v1561_v51, %v1561_v51  ;;  %v436_v62 = vunpack.c.h.bf16 %v403_v49 }
  0x49   : > { %535 = vadd.xlane.f32.xlu1 %v534_v60  ;;  %v510_v55 = vsel %vm473_vm2, %v453_v47, 0.0  ;;  %v454_v57 = vmul.f32 %v418_v48, %v418_v48  ;;  %v471_v60 = vmul.f32 %v435_v53, %v435_v53  ;;  %v420_v1 = vunpack.c.h.bf16 %v387_v50 }
  0x4a   : > { %487 = vadd.xlane.f32.xlu0 %v486_v61  ;;  %1233 = vmatpush3.bf16.msra.mxu0 %v383_v23  ;;  %v455_v61 = vmul.f32 %v419_v54, %v419_v54  ;;  %v561_v63 = vsel %vm473_vm2, %v470_v56, 0.0  ;;  %vm571_vm4 = vcmask 1043456   ;;  %v580_v28 = vlaneseq }
  0x4b   : > { %1253 = vmatpush3.bf16.msra.mxu1 %v399_v22  ;;  %1234 = vmatprep.subr.bf16.mxu0 %v1378_v27  ;;  %v513_v0 = vsel %vm473_vm2, %v454_v57, 0.0  ;;  %v564_v2 = vsel %vm473_vm2, %v471_v60, 0.0  ;;  %v456_v5 = vmul.f32 %v420_v1, %v420_v1  ;;  %v572_v9 = vsel %vm571_vm4, %v1561_v51, 0.0 }
  0x4c   : > { %1254 = vmatprep.subr.bf16.mxu1 %v1378_v27  ;;  %v581_v30 = vand.u32 127, %v580_v28  ;;  %v1621_v31 = vshrl.u32 %v580_v28, 7  ;;  %vm821_vm5 = vcmask 130112   ;;  %vm828_vm6 = vcmask 195712  }
  0x4d   : > { %538 = vadd.xlane.f32.xlu1 %v537_v3  ;;  %v516_v3 = vsel %vm473_vm2, %v455_v61, 0.0  ;;  %v519_v7 = vsel %vm473_vm2, %v456_v5, 0.0  ;;  %vm835_vm7 = vcmask 261312   ;;  %vm842_vm8 = vcmask 326912  }
  0x4e   : > { %490 = vadd.xlane.f32.xlu0 %v489_v4  ;;  %1235 = vmatpush3.bf16.msra.mxu0 %v385_v36  ;;  %v472_v4 = vmul.f32 %v436_v62, %v436_v62  ;;  %v830_v36 = vadd.s32 4294967272, %v581_v30  ;;  %v844_v38 = vadd.s32 4294967256, %v581_v30  ;;  %v1628_v39 = vsub.s32 %v581_v30, %v1621_v31 }
  0x4f   : > { %1255 = vmatpush3.bf16.msra.mxu1 %v401_v35  ;;  %1236 = vmatprep.subr.bf16.mxu0 %v1378_v27  ;;  %v858_v41 = vadd.s32 4294967240, %v581_v30  ;;  %v865_v44 = vadd.s32 4294967232, %v581_v30  ;;  %v872_v45 = vadd.s32 4294967224, %v581_v30  ;;  %v893_v54 = vadd.s32 4294967200, %v581_v30 }
  0x50   : > { %1256 = vmatprep.subr.bf16.mxu1 %v1378_v27  ;;  %v440_v27 = vpack.c.bf16 %v1571_v59, %v1571_v59  ;;  %v567_v6 = vsel %vm473_vm2, %v472_v4, 0.0  ;;  %v833_v48 = vsub.s32 %v830_v36, %v1621_v31  ;;  %v847_v53 = vsub.s32 %v844_v38, %v1621_v31 }
  0x51   : > { %541 = vadd.xlane.f32.xlu1 %v540_v8  ;;  %v575_v8 = vsel %vm571_vm4, %v1571_v59, 0.0  ;;  %vm849_vm9 = vcmask 392512   ;;  %vm856_vm10 = vcmask 458112   ;;  %v861_v57 = vsub.s32 %v858_v41, %v1621_v31 }
  0x52   : > { %493 = vadd.xlane.f32.xlu0 %v492_v11  ;;  %1237 = vmatpush3.bf16.msra.mxu0 %v387_v50  ;;  %v879_v50 = vadd.s32 4294967216, %v581_v30  ;;  %vm863_vm11 = vcmask 523712   ;;  %v1645_v60 = vsub.s32 %v872_v45, %v1621_v31  ;;  %vm870_vm12 = vcmask 589312  }
  0x53   : > { %1257 = vmatpush3.bf16.msra.mxu1 %v403_v49  ;;  %vm877_vm13 = vcmask 654912   ;;  %vm884_vm14 = vcmask 720512   ;;  %vm891_vm15 = vcmask 786112   ;;  %vm898_vm0 = vcmask 851712  }
  0x54   : > { %vm905_vm1 = vcmask 917312   ;;  %vm912_vm2 = vcmask 982912   ;;  %vm919_vm3 = vcmask 1048512  }
  0x55   : > { %544 = vadd.xlane.f32.xlu1 %v543_v14  ;;  %1239 = vmatmul.mubr.bf16.vlgmr.msra.gmra.mrb[0].mxu0 %v439_v58  ;;  %v1642_v58 = vsub.s32 %v865_v44, %v1621_v31 }
  0x56   : > { %496 = vadd.xlane.f32.xlu0 %v495_v17  ;;  %1259 = vmatmul.mubr.bf16.vlgmr.msra.gmra.mrb[0].mxu1 %v440_v27 }
  0x59   : > { %547 = vadd.xlane.f32.xlu1 %v546_v19 }
  0x5a   : > { %499 = vadd.xlane.f32.xlu0 %v498_v26 }
  0x5d   : > { %550 = vadd.xlane.f32.xlu1 %v549_v32  ;;  %v816_v32 = vadd.s32 4294967288, %v581_v30 }
  0x5e   : > { %502 = vadd.xlane.f32.xlu0 %v501_v33  ;;  %v823_v33 = vadd.s32 4294967280, %v581_v30 }
  0x5f   : > { %v819_v42 = vsub.s32 %v816_v32, %v1621_v31 }
  0x61   : > { %553 = vadd.xlane.f32.xlu1 %v552_v37  ;;  %v837_v37 = vadd.s32 4294967264, %v581_v30 }
  0x62   : > { %505 = vadd.xlane.f32.xlu0 %v504_v40  ;;  %v851_v40 = vadd.s32 4294967248, %v581_v30 }
  0x63   : > { %v840_v49 = vsub.s32 %v837_v37, %v1621_v31 }
  0x64   : > { %v854_v56 = vsub.s32 %v851_v40, %v1621_v31 }
  0x65   : > { %556 = vadd.xlane.f32.xlu1 %v555_v43  ;;  %v826_v43 = vsub.s32 %v823_v33, %v1621_v31 }
  0x66   : > { %508 = vadd.xlane.f32.xlu0 %v507_v46 }
  0x69   : > { %559 = vadd.xlane.f32.xlu1 %v558_v52  ;;  %v886_v52 = vadd.s32 4294967208, %v581_v30 }
  0x6a   : > { %511 = vadd.xlane.f32.xlu0 %v510_v55  ;;  %v900_v55 = vadd.s32 4294967192, %v581_v30 }
  0x6d   : > { %562 = vadd.xlane.f32.xlu1 %v561_v63  ;;  %v907_v63 = vadd.s32 4294967184, %v581_v30 }
  0x6e   : > { %514 = vadd.xlane.f32.xlu0 %v513_v0  ;;  %v914_v0 = vadd.s32 4294967176, %v581_v30 }
  0x6f   : > { %v1676_v32 = vsub.s32 %v907_v63, %v1621_v31 }
  0x71   : > { %565 = vadd.xlane.f32.xlu1 %v564_v2  ;;  %v1654_v2 = vsub.s32 %v879_v50, %v1621_v31 }
  0x72   : > { %517 = vadd.xlane.f32.xlu0 %v516_v3  ;;  %v1657_v3 = vsub.s32 %v886_v52, %v1621_v31 }
  0x75   : > { %568 = vadd.xlane.f32.xlu1 %v567_v6  ;;  %v1662_v6 = vsub.s32 %v893_v54, %v1621_v31 }
  0x76   : > { %520 = vadd.xlane.f32.xlu0 %v519_v7  ;;  %v1665_v7 = vsub.s32 %v900_v55, %v1621_v31 }
  0x79   : > { %576 = vadd.xlane.f32.xlu1 %v575_v8 }
  0x7a   : > { %573 = vadd.xlane.f32.xlu0 %v572_v9 }
  0xc6   : > { %v1585_v10 = vpop.xlane.xlu1 %523 }
  0xc7   : > { %v1587_v11 = vpop.xlane.xlu0 %475  ;;  %v924_v8 = vrot.slane %v1585_v10, %v1628_v39  ;;  %v1679_v10 = vsub.s32 %v914_v0, %v1621_v31 }
  0xc8   : > { %v815_v9 = vrot.slane %v1587_v11, %v1628_v39 }
  0xca   : > { %v1589_v12 = vpop.xlane.xlu1 %526 }
  0xcb   : > { %v1591_v13 = vpop.xlane.xlu0 %478  ;;  %v928_v1 = vrot.slane %v1589_v12, %v819_v42 }
  0xcc   : > { %v820_v27 = vrot.slane %v1591_v13, %v819_v42 }
  0xcd   : > { %v929_v11 = vsel %vm821_vm5, %v928_v1, %v924_v8 }
  0xce   : > { %v1593_v14 = vpop.xlane.xlu1 %529 }
  0xcf   : > { %v1595_v15 = vpop.xlane.xlu0 %481  ;;  %v933_v4 = vrot.slane %v1593_v14, %v826_v43 }
  0xd0   : > { %v827_v5 = vrot.slane %v1595_v15, %v826_v43 }
  0xd2   : > { %v1597_v16 = vpop.xlane.xlu1 %532 }
  0xd3   : > { %v1599_v17 = vpop.xlane.xlu0 %484  ;;  %v938_v12 = vrot.slane %v1597_v16, %v833_v48  ;;  %v822_v16 = vsel %vm821_vm5, %v820_v27, %v815_v9  ;;  %vm590_vm5 = vcmask 1041409  }
  0xd4   : > { %v834_v13 = vrot.slane %v1599_v17, %v833_v48 }
  0xd6   : > { %v1601_v18 = vpop.xlane.xlu1 %535 }
  0xd7   : > { %v1603_v20 = vpop.xlane.xlu0 %487  ;;  %v943_v14 = vrot.slane %v1601_v18, %v840_v49  ;;  %v934_v18 = vsel %vm828_vm6, %v933_v4, %v929_v11 }
  0xd8   : > { %v841_v15 = vrot.slane %v1603_v20, %v840_v49  ;;  %v829_v20 = vsel %vm828_vm6, %v827_v5, %v822_v16  ;;  %v939_v38 = vsel %vm835_vm7, %v938_v12, %v934_v18  ;;  %vm594_vm6 = vcmask 25600  }
  0xd9   : > { %v836_v40 = vsel %vm835_vm7, %v834_v13, %v829_v20  ;;  %vm776_vm7 = vcmask 519168  }
  0xda   : > { %v1605_v22 = vpop.xlane.xlu1 %538  ;;  %v843_v42 = vsel %vm842_vm8, %v841_v15, %v836_v40  ;;  %v597_v40 = vld [vmem:[#allocation3 + $0x4] sm:$0xf] }
  0xdb   : > { %v1607_v23 = vpop.xlane.xlu0 %490  ;;  %v948_v17 = vrot.slane %v1605_v22, %v847_v53 }
  0xdc   : > { %v848_v33 = vrot.slane %v1607_v23, %v847_v53  ;;  %v944_v23 = vsel %vm842_vm8, %v943_v14, %v939_v38 }
  0xdd   : > { %v949_v45 = vsel %vm849_vm9, %v948_v17, %v944_v23 }
  0xde   : > { %v1609_v19 = vpop.xlane.xlu1 %541  ;;  %v850_v48 = vsel %vm849_vm9, %v848_v33, %v843_v42 }
  0xdf   : > { %v1611_v24 = vpop.xlane.xlu0 %493  ;;  %v953_v36 = vrot.slane %v1609_v19, %v854_v56 }
  0xe0   : > { %v855_v37 = vrot.slane %v1611_v24, %v854_v56 }
  0xe1   : > { %v954_v49 = vsel %vm856_vm10, %v953_v36, %v949_v45 }
  0xe2   : > { %v1613_v25 = vpop.xlane.xlu1 %544  ;;  %v857_v50 = vsel %vm856_vm10, %v855_v37, %v850_v48 }
  0xe3   : > { %v1615_v26 = vpop.xlane.xlu0 %496  ;;  %v958_v41 = vrot.slane %v1613_v25, %v861_v57 }
  0xe4   : > { %v862_v22 = vrot.slane %v1615_v26, %v861_v57 }
  0xe5   : > { %v959_v52 = vsel %vm863_vm11, %v958_v41, %v954_v49  ;;  %v779_v49 = vld [vmem:[#allocation4] sm:$0x3] }
  0xe6   : > { %v1617_v29 = vpop.xlane.xlu1 %547  ;;  %v864_v53 = vsel %vm863_vm11, %v862_v22, %v857_v50 }
  0xe7   : > { %v1619_v21 = vpop.xlane.xlu0 %499  ;;  %v963_v43 = vrot.slane %v1617_v29, %v1642_v58 }
  0xe8   : > { %v869_v19 = vrot.slane %v1619_v21, %v1642_v58 }
  0xe9   : > { %v964_v54 = vsel %vm870_vm12, %v963_v43, %v959_v52 }
  0xea   : > { %v1623_v34 = vpop.xlane.xlu1 %550  ;;  %v871_v55 = vsel %vm870_vm12, %v869_v19, %v864_v53 }
  0xeb   : > { %v1625_v35 = vpop.xlane.xlu0 %502  ;;  %v968_v25 = vrot.slane %v1623_v34, %v1645_v60 }
  0xec   : > { %v876_v26 = vrot.slane %v1625_v35, %v1645_v60 }
  0xed   : > { %v969_v58 = vsel %vm877_vm13, %v968_v25, %v964_v54 }
  0xee   : > { %v1632_v46 = vpop.xlane.xlu1 %553  ;;  %v878_v60 = vsel %vm877_vm13, %v876_v26, %v871_v55  ;;  %v1051_v55 = vsub.s32 (!%p1198_p9), 0, %v1621_v31 }
  0xef   : > { %v1634_v47 = vpop.xlane.xlu0 %505  ;;  %v973_v29 = vrot.slane %v1632_v46, %v1654_v2 }
  0xf0   : > { %v883_v21 = vrot.slane %v1634_v47, %v1654_v2 }
  0xf2   : > { %v1647_v61 = vpop.xlane.xlu1 %556  ;;  %v885_v0 = vsel %vm884_vm14, %v883_v21, %v878_v60 }
  0xf3   : > { %v1649_v62 = vpop.xlane.xlu0 %508  ;;  %v978_v34 = vrot.slane %v1647_v61, %v1657_v3 }
  0xf4   : > { %v890_v35 = vrot.slane %v1649_v62, %v1657_v3  ;;  %v974_v62 = vsel %vm884_vm14, %v973_v29, %v969_v58 }
  0xf5   : > { %v979_v2 = vsel %vm891_vm15, %v978_v34, %v974_v62 }
  0xf6   : > { %v560_v28 = vpop.xlane.xlu1 %559  ;;  %v892_v3 = vsel %vm891_vm15, %v890_v35, %v885_v0 }
  0xf7   : > { %v512_v30 = vpop.xlane.xlu0 %511  ;;  %v983_v56 = vrot.slane %v560_v28, %v1662_v6 }
  0xf8   : > { %v897_v46 = vrot.slane %v512_v30, %v1662_v6 }
  0xf9   : > { %v984_v4 = vsel %vm898_vm0, %v983_v56, %v979_v2 }
  0xfa   : > { %v563_v24 = vpop.xlane.xlu1 %562  ;;  %v899_v5 = vsel %vm898_vm0, %v897_v46, %v892_v3  ;;  %v1058_v46 = vsub.s32 (!%p1198_p9), 1, %v1621_v31 }
  0xfb   : > { %v515_v44 = vpop.xlane.xlu0 %514  ;;  %v988_v63 = vrot.slane %v563_v24, %v1665_v7 }
  0xfc   : > { %v904_v61 = vrot.slane %v515_v44, %v1665_v7 }
  0xfd   : > { %v989_v7 = vsel %vm905_vm1, %v988_v63, %v984_v4  ;;  %v1380_v63 = vmov (!%p1198_p9), 0  }
  0xfe   : > { %v566_v57 = vpop.xlane.xlu1 %565  ;;  %v906_v9 = vsel %vm905_vm1, %v904_v61, %v899_v5  ;;  %1331 = vset.pattern.permute.xlu0 (!%p1198_p9), %v1380_v63  ;;  %1332 = vset.pattern.permute.xlu1 (!%p1198_p9), %v1380_v63 }
  0xff   : > { %v518_v47 = vpop.xlane.xlu0 %517  ;;  %v993_v1 = vrot.slane %v566_v57, %v1676_v32 }
 0x100   : > { %v911_v27 = vrot.slane %v518_v47, %v1676_v32 }
 0x101   : > { %v994_v14 = vsel %vm912_vm2, %v993_v1, %v989_v7 }
 0x102   : > { %v569_v6 = vpop.xlane.xlu1 %568  ;;  %v913_v15 = vsel %vm912_vm2, %v911_v27, %v906_v9 }
 0x103   : > { %v521_v8 = vpop.xlane.xlu0 %520  ;;  %v998_v12 = vrot.slane %v569_v6, %v1679_v10 }
 0x104   : > { %v918_v13 = vrot.slane %v521_v8, %v1679_v10  ;;  %v570_v10 = vld [vmem:[#allocation2] sm:$0x3] }
 0x105   : > { %v999_v28 = vsel %vm919_vm3, %v998_v12, %v994_v14 }
 0x106   : > { %v920_v30 = vsel %vm919_vm3, %v918_v13, %v913_v15  ;;  %v1009_v32 = vmul.f32 %v999_v28, %v1571_v59  ;;  %v577_v33 = vpop.xlane.xlu1 %576 }
 0x107   : > { %v1008_v11 = vmul.f32 %v920_v30, %v1561_v51  ;;  %v574_v18 = vpop.xlane.xlu0 %573  ;;  %v589_v20 = vrot.slane %v577_v33, %v1628_v39  ;;  %v596_v51 = vld [vmem:[#allocation3] sm:$0xf] }
 0x108   : > { %v1013_v16 = vsel %vm571_vm4, %v1009_v32, 0.0  ;;  %v585_v36 = vrot.slane %v574_v18, %v1628_v39 }
 0x109   : > { %v1010_v17 = vsel %vm571_vm4, %v1008_v11, 0.0  ;;  %1014 = vadd.xlane.f32.xlu1 %v1013_v16 }
 0x10a   : > { %1011 = vadd.xlane.f32.xlu0 %v1010_v17  ;;  %v591_v37 = vsel %vm590_vm5, %v589_v20, %v585_v36 }
 0x10b   : > { %v593_v59 = vadd.f32 %v591_v37, %v570_v10 }
 0x10d   : > { %595 = vst.msk [vmem:[#allocation2] sm:$0x3] %vm594_vm6, %v593_v59 }
 0x114   : > { %v1034_v34 = vld [vmem:[#allocation2] sm:$0x3] (!%p1198_p9) }
 0x115   : > { %vm1038_vm4 = vcmp.gt.f32.partialorder (!%p1198_p9), %v1034_v34, 0.0 }
 0x116   : > { %v1039_v56 = vsel (!%p1198_p9), %vm1038_vm4, %v1034_v34, 1.0 }
 0x117   : > { %v1052_v47 = vrot.slane (!%p1198_p9), %v1039_v56, %v1051_v55  ;;  %v1059_v60 = vrot.slane (!%p1198_p9), %v1039_v56, %v1058_v46 }
 0x11a   : > { %1054 = vbcast.lane.b32.xlu1 (!%p1198_p9), %v1052_v47, 256 }
 0x11e   : > { %1061 = vbcast.lane.b32.xlu1 (!%p1198_p9), %v1059_v60, 256 }
 0x128   : > { %v680_v38 = vpop.f32.mrb[0].mxu0 }
 0x129   : > { %v774_v41 = vadd.f32 %v680_v38, %v596_v51  ;;  %v1240_v22 = vpop.f32.mrb[1].mxu0  ;;  %v768_v42 = vpop.f32.mrb[0].mxu1 }
 0x12a   : > { %v683_v23 = vpop.f32.mrb[2].mxu0  ;;  %v775_v19 = vadd.f32 %v768_v42, %v597_v40  ;;  %v1260_v24 = vpop.f32.mrb[1].mxu1 }
 0x12b   : > { %777 = vst.msk [vmem:[#allocation3] sm:$0xf] %vm776_vm7, %v774_v41  ;;  %v1241_v43 = vpop.f32.mrb[3].mxu0  ;;  %v771_v44 = vpop.f32.mrb[2].mxu1 }
 0x12c   : > { %778 = vst.msk [vmem:[#allocation3 + $0x4] sm:$0xf] %vm776_vm7, %v775_v19  ;;  %v1261_v45 = vpop.f32.mrb[3].mxu1 }
 0x132   : > { %v1035_v52 = vld [vmem:[#allocation3] sm:$0xf] (!%p1198_p9) }
 0x133   : > { %v1036_v53 = vld [vmem:[#allocation3 + $0x4] sm:$0xf] (!%p1198_p9)  ;;  %v1040_v35 = vmul.f32 (!%p1198_p9), %v1035_v52, %v1035_v52 }
 0x134   : > { %v1041_v54 = vmul.f32 (!%p1198_p9), %v1036_v53, %v1036_v53 }
 0x135   : > { %v1042_v57 = vsel (!%p1198_p9), %vm776_vm7, %v1040_v35, 0.0 }
 0x136   : > { %1043 = vadd.xlane.f32.xlu0 (!%p1198_p9), %v1042_v57  ;;  %v1045_v58 = vsel (!%p1198_p9), %vm776_vm7, %v1041_v54, 0.0 }
 0x13a   : > { %1046 = vadd.xlane.f32.xlu0 (!%p1198_p9), %v1045_v58 }
 0x196   : > { %v1015_v48 = vpop.xlane.xlu1 %1014 }
 0x197   : > { %v1012_v25 = vpop.xlane.xlu0 %1011  ;;  %v1025_v26 = vrot.slane %v1015_v48, %v1628_v39  ;;  %1033 = sbr.rel (%p1198_p9) target bundleno = 799 (0x31f), region = 118 }
 0x198   : > { %v1021_v50 = vrot.slane %v1012_v25, %v1628_v39 }
 0x19a   : > { %v1026_v29 = vsel %vm590_vm5, %v1025_v26, %v1021_v50  ;;  %v1055_v61 = vpop.permute.xlu1 (!%p1198_p9), %1054 }
 0x19b   : > { %v1028_v21 = vadd.f32 %v1026_v29, %v779_v49  ;;  %1333 = vrcp.f32 (!%p1198_p9), %v1055_v61 }
 0x19d   : > { %1029 = vst.msk [vmem:[#allocation4] sm:$0x3] %vm594_vm6, %v1028_v21 }
 0x19e   : > { %v1062_v62 = vpop.permute.xlu1 %1061 }
 0x19f   : > { %1335 = vrcp.f32 %v1062_v62 }
 0x1a4   : > { %v1037_v7 = vld [vmem:[#allocation4] sm:$0x3] }
 0x1a5   : > { %v1334_v0 = vpop.eup %1333 }
 0x1a9   : > { %v1336_v27 = vpop.eup %1335 }
 0x1c3   : > { %v1044_v1 = vpop.xlane.xlu0 %1043 }
 0x1c4   : > { %v1066_v31 = vmul.f32 %v1334_v0, %v1044_v1 }
 0x1c6   : > { %1072 = vperm.xlu0 %1331, %v1066_v31  }
 0x1c7   : > { %v1047_v2 = vpop.xlane.xlu0 %1046 }
 0x1c8   : > { %v1068_v3 = vmul.f32 %v1336_v27, %v1047_v2 }
 0x1ca   : > { %1075 = vperm.xlu1 %1332, %v1068_v3  }
 0x245   : > { %v1073_v4 = vpop.permute.xlu0 %1072 }
 0x246   : > { %v1080_v6 = vrot.slane %v1073_v4, %v1628_v39 }
 0x249   : > { %v1076_v5 = vpop.permute.xlu1 %1075 }
 0x24a   : > { %v1084_v8 = vrot.slane %v1076_v5, %v1628_v39 }
 0x24c   : > { %v1085_v9 = vsel %vm590_vm5, %v1084_v8, %v1080_v6 }
 0x24d   : > { %v1087_v12 = vsub.f32 %v1037_v7, %v1085_v9 }
 0x24f   : > { %v1088_v13 = vsel %vm594_vm6, %v1087_v12, 0.0 }
 0x250   : > { %1089 = vadd.xlane.f32.xlu1 %v1088_v13 }
 0x2dd   : > { %v1090_v14 = vpop.xlane.xlu1 %1089 }
 0x2de   : > { %v1091_v15 = vrot.slane %v1090_v14, 4 }
 0x2e0   : > { %v1092_v28 = vadd.f32 %v1091_v15, %v1090_v14 }
 0x2e2   : > { %v1093_v30 = vrot.slane %v1092_v28, 2 }
 0x2e4   : > { %v1094_v32 = vadd.f32 %v1093_v30, %v1092_v28 }
 0x2e6   : > { %v1095_v11 = vrot.slane %v1094_v32, 1 }
 0x2e8   : > { %v1096_v16 = vadd.f32 %v1095_v11, %v1094_v32 }
 0x2ea   : > { %1262 = vpush %v1096_v16 }
 0x31b   : > { %s1263_s9 = spop %1262 }
 0x31c   : > { %s1098_s11 = smul.f32 3.0517578e-05, %s1263_s9 }
 0x31e   : > { %1100 = sst [smem:[#allocation7]] %s1098_s11 }
 0x31f PF: > { %p1268_p10 = scmp.eq.s32.totalorder %s1413_s12, 1  ;;  %s1337_s17 = scalar_lea.hbm %s1785_s2, 16 }
 0x320   : > { %p1338_p11 = scmp.ne.s32.totalorder %s1785_s2, %s1337_s17  ;;  %p1343_p0 = scmp.lt.u32.totalorder %s1337_s17, %s1785_s2 }
 0x322   : > { %p1339_p12 = pnand %p1338_p11, %p1268_p10 }
 0x324   : > { %p1340_p13 = pneg %p1339_p12 }
 0x326   : > { %p1345_p1 = pnand %p1343_p0, %p1340_p13 }
 0x328   : > { %1348 = shalt.err (!%p1345_p1)
}
 0x329   : > { %s1381_s22 = smov [#allocation7]  }
 0x32a   : > { %1265 = dma.smem_to_hbm (%p1268_p10), %s1381_s22, 16, %s1785_s2, [#allocation8]  }
 0x32b   : > { %1362 = dma.done.wait (%p1268_p10), [#allocation8], 16  }
 0x32c   : > { %1364 = vsyncadd (%p1268_p10), [#allocation8], 4294967280 }
 0x32d   : > { %1114 = sfence }
 0x32e PF: > { %p10_p2 = scmp.ge.s32.totalorder %s1416_s13, 4   ;;  %s1787_s9 = smov %s1371_s10 }
 0x32f   : > { %s1788_s10 = smov %s1425_s16  ;;  %s1789_s11 = smov %s1416_s13 }
 0x330   :  { %12 = sbr.rel (!%p10_p2) target bundleno = 2 (0x2), region = 159 }
 0x337   :  { %1120 = vsyncpa [#allocation8], 1 }
 0x338   :  { %1122 = vsyncpa [#allocation8 + $0x1], 1 }

</bundles_post_ra>
